<compile_context>
chip_gen: v5e
topology: v5e:2x2
jax: 0.10.0
libtpu: 0.0.40
codegen_flags: <defaults>
</compile_context>

<pallas_src>
import math
import functools

import jax
import jax.numpy as jnp
from jax.experimental import pallas as pl
from jax.experimental.pallas import tpu as pltpu


# ----------------------------- in-kernel helpers -----------------------------

def _layer_norm(z, g, b, eps=1e-5):
    mean = jnp.mean(z, axis=-1, keepdims=True)
    var = jnp.mean((z - mean) ** 2, axis=-1, keepdims=True)
    return (z - mean) * jax.lax.rsqrt(var + eps) * g + b


def _attention_core(q, k, v, mask, wo, bo, num_heads, scale):
    """q:(Sq,D), k/v:(Sk,D) f32; mask:(Mq,Sk) additive; wo:(D,D) bf16; bo:(1,D) f32."""
    Sq, D = q.shape
    Sk = k.shape[0]
    Dh = D // num_heads
    bf = jnp.bfloat16

    # Heads on the leading (batch) axis -> two batched MXU einsums and a SINGLE softmax over
    # the (H, Sq, Sk) tensor; no serial per-head accumulation chain.
    # TODO(synk): at real head dims (Dh >= 128) build (H, S, Dh) via reshape/transpose or a
    #             flash-style loop instead of static lane-slice stacking.
    qh = jnp.stack([q[:, h * Dh:(h + 1) * Dh] for h in range(num_heads)], axis=0)
    kh = jnp.stack([k[:, h * Dh:(h + 1) * Dh] for h in range(num_heads)], axis=0)
    vh = jnp.stack([v[:, h * Dh:(h + 1) * Dh] for h in range(num_heads)], axis=0)

    s = jnp.einsum("hqd,hkd->hqk", qh.astype(bf), kh.astype(bf),
                   preferred_element_type=jnp.float32) * scale
    # single hoisted mask broadcast, shared by all heads
    s = s + jnp.broadcast_to(mask, (Sq, Sk))[None, :, :]
    s = s - jnp.max(s, axis=-1, keepdims=True)
    p = jnp.exp(s)
    p = p * pl.reciprocal(jnp.sum(p, axis=-1, keepdims=True), approx=True)

    ctx = jnp.einsum("hqk,hkd->hqd", p.astype(bf), vh.astype(bf),
                     preferred_element_type=jnp.float32)                     # (H, Sq, Dh)
    ctx = jnp.concatenate([ctx[h] for h in range(num_heads)], axis=-1)       # (Sq, D)
    # ONE head-merged output projection (lane-dense D-wide result).
    return jnp.dot(ctx.astype(bf), wo, preferred_element_type=jnp.float32) + bo


def _self_attention(x, mask, wqkv, bqkv, wo, bo, num_heads, scale):
    D = x.shape[1]
    qkv = jnp.dot(x.astype(jnp.bfloat16), wqkv,
                  preferred_element_type=jnp.float32) + bqkv                 # (S, 3D)
    return _attention_core(qkv[:, :D], qkv[:, D:2 * D], qkv[:, 2 * D:],
                           mask, wo, bo, num_heads, scale)


def _cross_attention(xq, xkv, mask, wq, bq, wkv, bkv, wo, bo, num_heads, scale):
    D = xq.shape[1]
    q = jnp.dot(xq.astype(jnp.bfloat16), wq, preferred_element_type=jnp.float32) + bq
    kv = jnp.dot(xkv.astype(jnp.bfloat16), wkv, preferred_element_type=jnp.float32) + bkv
    return _attention_core(q, kv[:, :D], kv[:, D:], mask, wo, bo, num_heads, scale)


def _ffn(x, w1, b1, w2, b2):
    h = jnp.dot(x.astype(jnp.bfloat16), w1, preferred_element_type=jnp.float32) + b1
    h = jnp.maximum(h, 0.0)
    return jnp.dot(h.astype(jnp.bfloat16), w2, preferred_element_type=jnp.float32) + b2


def _const_spec(shape):
    # full-extent weight block, constant across the batch grid
    return pl.BlockSpec(shape, lambda b: (0,) * len(shape))


# ----------------------------- encoder block (one launch) -----------------------------

def _encoder_kernel(x_ref, mask_ref,
                    wqkv_ref, bqkv_ref, wo_ref, bo_ref, g1_ref, be1_ref,
                    w1_ref, b1_ref, w2_ref, b2_ref, g2_ref, be2_ref,
                    o_ref, *, num_heads, scale):
    x = x_ref[0]                       # (S, D) f32
    mask = mask_ref[0]                 # (1, S) additive pad mask

    attn = _self_attention(x, mask, wqkv_ref[...], bqkv_ref[...],
                           wo_ref[...], bo_ref[...], num_heads, scale)
    z = _layer_norm(x + attn, g1_ref[...], be1_ref[...])
    f = _ffn(z, w1_ref[...], b1_ref[...], w2_ref[...], b2_ref[...])
    o_ref[0] = _layer_norm(z + f, g2_ref[...], be2_ref[...]).astype(o_ref.dtype)


def encoder_forward(x, pad_mask, p, num_heads):
    B, S, D = x.shape
    F = p["ffn"]["w1"].shape[1]
    scale = 1.0 / math.sqrt(D // num_heads)
    bf = jnp.bfloat16
    mha, ffn, ln1, ln2 = p["mha"], p["ffn"], p["ln1"], p["ln2"]
    kern = functools.partial(_encoder_kernel, num_heads=num_heads, scale=scale)
    return pl.pallas_call(
        kern,
        out_shape=jax.ShapeDtypeStruct((B, S, D), x.dtype),
        grid=(B,),
        in_specs=[
            pl.BlockSpec((1, S, D), lambda b: (b, 0, 0)),       # x
            pl.BlockSpec((1, 1, S), lambda b: (b, 0, 0)),       # pad mask (per-batch, all heads)
            _const_spec((D, 3 * D)), _const_spec((1, 3 * D)),   # fused QKV
            _const_spec((D, D)), _const_spec((1, D)),           # wo, bo
            _const_spec((1, D)), _const_spec((1, D)),           # ln1
            _const_spec((D, F)), _const_spec((1, F)),           # ffn w1, b1
            _const_spec((F, D)), _const_spec((1, D)),           # ffn w2, b2
            _const_spec((1, D)), _const_spec((1, D)),           # ln2
        ],
        out_specs=pl.BlockSpec((1, S, D), lambda b: (b, 0, 0)),
        compiler_params=pltpu.CompilerParams(dimension_semantics=("parallel",)),
    )(x, pad_mask,
      mha["wqkv"].astype(bf), mha["bqkv"], mha["wo"].astype(bf), mha["bo"],
      ln1["g"], ln1["b"],
      ffn["w1"].astype(bf), ffn["b1"], ffn["w2"].astype(bf), ffn["b2"],
      ln2["g"], ln2["b"])


# ----------------------------- decoder block (one launch, incl. vocab proj) -----------------------------

def _decoder_kernel(y_ref, enc_ref, pad_mask_ref, tgt_mask_ref,
                    s_wqkv_ref, s_bqkv_ref, s_wo_ref, s_bo_ref, g1_ref, be1_ref,
                    c_wq_ref, c_bq_ref, c_wkv_ref, c_bkv_ref, c_wo_ref, c_bo_ref,
                    g2_ref, be2_ref,
                    f_w1_ref, f_b1_ref, f_w2_ref, f_b2_ref, g3_ref, be3_ref,
                    v_w_ref, v_b_ref, o_ref, *, num_heads, scale):
    y = y_ref[0]                       # (T, D)
    enc = enc_ref[0]                   # (S, D)
    pad_mask = pad_mask_ref[0]         # (1, S)
    tgt_mask = tgt_mask_ref[0]         # (T, T)

    a1 = _self_attention(y, tgt_mask, s_wqkv_ref[...], s_bqkv_ref[...],
                         s_wo_ref[...], s_bo_ref[...], num_heads, scale)
    z1 = _layer_norm(y + a1, g1_ref[...], be1_ref[...])

    a2 = _cross_attention(z1, enc, pad_mask, c_wq_ref[...], c_bq_ref[...],
                          c_wkv_ref[...], c_bkv_ref[...], c_wo_ref[...], c_bo_ref[...],
                          num_heads, scale)
    z2 = _layer_norm(z1 + a2, g2_ref[...], be2_ref[...])

    f = _ffn(z2, f_w1_ref[...], f_b1_ref[...], f_w2_ref[...], f_b2_ref[...])
    z3 = _layer_norm(z2 + f, g3_ref[...], be3_ref[...])

    # Vocab projection fused into the same kernel (activation already resident in VMEM).
    # TODO(synk): at real vocab sizes, add a second grid axis over N with tn % 128 == 0
    #             so the logit store is lane-dense.
    logits = jnp.dot(z3.astype(jnp.bfloat16), v_w_ref[...],
                     preferred_element_type=jnp.float32) + v_b_ref[...]
    o_ref[0] = logits.astype(o_ref.dtype)


def decoder_forward(y, enc_out, pad_mask, tgt_mask, p, num_heads):
    B, T, D = y.shape
    S = enc_out.shape[1]
    F = p["ffn"]["w1"].shape[1]
    V = p["out"]["w"].shape[1]
    scale = 1.0 / math.sqrt(D // num_heads)
    bf = jnp.bfloat16
    smha, cmha, ffn = p["self_mha"], p["cross_mha"], p["ffn"]
    ln1, ln2, ln3, out = p["ln1"], p["ln2"], p["ln3"], p["out"]
    kern = functools.partial(_decoder_kernel, num_heads=num_heads, scale=scale)
    return pl.pallas_call(
        kern,
        out_shape=jax.ShapeDtypeStruct((B, T, V), y.dtype),
        grid=(B,),
        in_specs=[
            pl.BlockSpec((1, T, D), lambda b: (b, 0, 0)),       # y (embedded target)
            pl.BlockSpec((1, S, D), lambda b: (b, 0, 0)),       # encoder output
            pl.BlockSpec((1, 1, S), lambda b: (b, 0, 0)),       # pad mask
            pl.BlockSpec((1, T, T), lambda b: (b, 0, 0)),       # causal+pad target mask
            _const_spec((D, 3 * D)), _const_spec((1, 3 * D)),   # self-attn fused QKV
            _const_spec((D, D)), _const_spec((1, D)),           # self-attn wo, bo
            _const_spec((1, D)), _const_spec((1, D)),           # ln1
            _const_spec((D, D)), _const_spec((1, D)),           # cross-attn wq, bq
            _const_spec((D, 2 * D)), _const_spec((1, 2 * D)),   # cross-attn fused K|V
            _const_spec((D, D)), _const_spec((1, D)),           # cross-attn wo, bo
            _const_spec((1, D)), _const_spec((1, D)),           # ln2
            _const_spec((D, F)), _const_spec((1, F)),           # ffn w1, b1
            _const_spec((F, D)), _const_spec((1, D)),           # ffn w2, b2
            _const_spec((1, D)), _const_spec((1, D)),           # ln3
            _const_spec((D, V)), _const_spec((1, V)),           # vocab projection
        ],
        out_specs=pl.BlockSpec((1, T, V), lambda b: (b, 0, 0)),
        compiler_params=pltpu.CompilerParams(dimension_semantics=("parallel",)),
    )(y, enc_out, pad_mask, tgt_mask,
      smha["wqkv"].astype(bf), smha["bqkv"], smha["wo"].astype(bf), smha["bo"],
      ln1["g"], ln1["b"],
      cmha["wq"].astype(bf), cmha["bq"], cmha["wkv"].astype(bf), cmha["bkv"],
      cmha["wo"].astype(bf), cmha["bo"],
      ln2["g"], ln2["b"],
      ffn["w1"].astype(bf), ffn["b1"], ffn["w2"].astype(bf), ffn["b2"],
      ln3["g"], ln3["b"],
      out["w"].astype(bf), out["b"])


# ----------------------------- plain-JAX glue -----------------------------

def create_masks(src, target):
    # pad token id == 0; additive masks (0 keep / -1e9 drop), one block per batch element,
    # shared by all heads (no per-head broadcast in HBM).
    T = target.shape[1]
    pad_mask = jnp.where((src != 0)[:, None, :], 0.0, -1e9).astype(jnp.float32)   # (B, 1, S)
    causal = jnp.tril(jnp.ones((T, T), dtype=bool))[None]                          # (1, T, T)
    tgt_keep = (target != 0)[:, :, None] & causal                                  # (B, T, T)
    tgt_mask = jnp.where(tgt_keep, 0.0, -1e9).astype(jnp.float32)
    # Note: fully-masked (pad) query rows degenerate to uniform attention; those rows are pad
    # outputs, matching the reference semantics (query-axis pad masking, as in the reference).
    return pad_mask, tgt_mask


def positional_encoding(max_len, d_model):
    pos = jnp.arange(max_len, dtype=jnp.float32)[:, None]
    i = jnp.arange(0, d_model, 2, dtype=jnp.float32)
    div = jnp.exp(-math.log(10000.0) * i / d_model)
    pe = jnp.zeros((max_len, d_model), jnp.float32)
    pe = pe.at[:, 0::2].set(jnp.sin(pos * div))
    pe = pe.at[:, 1::2].set(jnp.cos(pos * div))
    return pe


def transformer_forward(params, src, target, num_heads):
    pad_mask, tgt_mask = create_masks(src, target)
    pe = params["pe"]
    # TODO(synk): PositionalEncoding dropout omitted (inference / eval semantics).
    emb_src = params["enc_emb"][src] + pe[None, : src.shape[1]]
    emb_tgt = params["dec_emb"][target] + pe[None, : target.shape[1]]
    enc_out = encoder_forward(emb_src, pad_mask, params["encoder"], num_heads)
    logits = decoder_forward(emb_tgt, enc_out, pad_mask, tgt_mask,
                             params["decoder"], num_heads)
    return logits


# ----------------------------- parameter init -----------------------------

def _init_linear(key, din, dout):
    w = jax.random.normal(key, (din, dout), jnp.float32) * 0.02
    b = jnp.zeros((1, dout), jnp.float32)
    return {"w": w, "b": b}


def _init_self_mha(key, d_model):
    ks = jax.random.split(key, 4)
    wq, wk, wv, wo = [jax.random.normal(k, (d_model, d_model), jnp.float32) * 0.02 for k in ks]
    return {
        "wqkv": jnp.concatenate([wq, wk, wv], axis=1),       # fused (D, 3D) QKV projection
        "bqkv": jnp.zeros((1, 3 * d_model), jnp.float32),
        "wo": wo, "bo": jnp.zeros((1, d_model), jnp.float32),
    }


def _init_cross_mha(key, d_model):
    ks = jax.random.split(key, 4)
    wq, wk, wv, wo = [jax.random.normal(k, (d_model, d_model), jnp.float32) * 0.02 for k in ks]
    return {
        "wq": wq, "bq": jnp.zeros((1, d_model), jnp.float32),
        "wkv": jnp.concatenate([wk, wv], axis=1),            # fused (D, 2D) K|V projection
        "bkv": jnp.zeros((1, 2 * d_model), jnp.float32),
        "wo": wo, "bo": jnp.zeros((1, d_model), jnp.float32),
    }


def _init_ffn(key, d_model, d_ff):
    k1, k2 = jax.random.split(key)
    l1 = _init_linear(k1, d_model, d_ff)
    l2 = _init_linear(k2, d_ff, d_model)
    return {"w1": l1["w"], "b1": l1["b"], "w2": l2["w"], "b2": l2["b"]}


def _init_ln(d_model):
    return {"g": jnp.ones((1, d_model), jnp.float32), "b": jnp.zeros((1, d_model), jnp.float32)}


def init_params(key, d_model, num_heads, d_ff, max_seq_len, src_vocab, tgt_vocab):
    ks = jax.random.split(key, 8)
    return {
        "enc_emb": jax.random.normal(ks[0], (src_vocab, d_model), jnp.float32) * 0.02,
        "dec_emb": jax.random.normal(ks[1], (tgt_vocab, d_model), jnp.float32) * 0.02,
        "pe": positional_encoding(max_seq_len, d_model),
        "encoder": {
            "mha": _init_self_mha(ks[2], d_model),
            "ffn": _init_ffn(ks[3], d_model, d_ff),
            "ln1": _init_ln(d_model),
            "ln2": _init_ln(d_model),
        },
        "decoder": {
            "self_mha": _init_self_mha(ks[4], d_model),
            "cross_mha": _init_cross_mha(ks[5], d_model),
            "ffn": _init_ffn(ks[6], d_model, d_ff),
            "ln1": _init_ln(d_model),
            "ln2": _init_ln(d_model),
            "ln3": _init_ln(d_model),
            "out": _init_linear(ks[7], d_model, tgt_vocab),
        },
    }


# ----------------------------- main -----------------------------

if __name__ == "__main__":
    d_model, num_heads, d_ff = 32, 4, 64
    max_seq_len = 8
    src_vocab, tgt_vocab = 16, 16
    B, S, T = 2, 8, 8

    root = jax.random.PRNGKey(0)
    k_params, k_src, k_tgt = jax.random.split(root, 3)
    params = init_params(k_params, d_model, num_heads, d_ff, max_seq_len, src_vocab, tgt_vocab)

    src = jax.random.randint(k_src, (B, S), 0, src_vocab, dtype=jnp.int32)
    target = jax.random.randint(k_tgt, (B, T), 0, tgt_vocab, dtype=jnp.int32)
    # make sure there is at least one pad token so the masks are exercised
    src = src.at[0, -1].set(0)
    target = target.at[1, -1].set(0)

    fwd = jax.jit(functools.partial(transformer_forward, num_heads=num_heads))
    out = fwd(params, src, target)
    jax.block_until_ready(out)

    assert out.shape == (B, T, tgt_vocab), out.shape
    assert jnp.all(jnp.isfinite(out))
    print("KERNEL_OK")
</pallas_src>

<mosaic_0001>
module attributes {stable_mosaic.version = 11 : i64} {
  func.func @_encoder_kernel(%arg0: i32, %arg1: memref<1x8x32xf32, #tpu.memory_space<vmem>>, %arg2: memref<1x1x8xf32, #tpu.memory_space<vmem>>, %arg3: memref<32x96xbf16, #tpu.memory_space<vmem>>, %arg4: memref<1x96xf32, #tpu.memory_space<vmem>>, %arg5: memref<32x32xbf16, #tpu.memory_space<vmem>>, %arg6: memref<1x32xf32, #tpu.memory_space<vmem>>, %arg7: memref<1x32xf32, #tpu.memory_space<vmem>>, %arg8: memref<1x32xf32, #tpu.memory_space<vmem>>, %arg9: memref<32x64xbf16, #tpu.memory_space<vmem>>, %arg10: memref<1x64xf32, #tpu.memory_space<vmem>>, %arg11: memref<64x32xbf16, #tpu.memory_space<vmem>>, %arg12: memref<1x32xf32, #tpu.memory_space<vmem>>, %arg13: memref<1x32xf32, #tpu.memory_space<vmem>>, %arg14: memref<1x32xf32, #tpu.memory_space<vmem>>, %arg15: memref<1x8x32xf32, #tpu.memory_space<vmem>>) attributes {dimension_semantics = [#tpu.dimension_semantics<parallel>], iteration_bounds = array<i64: 2>, scalar_prefetch = 0 : i64, scratch_operands = 0 : i64, tpu.core_type = #tpu.core_type<tc>, window_params = [{transform_indices = @transform_0, window_bounds = array<i64: 1, 8, 32>}, {transform_indices = @transform_1, window_bounds = array<i64: 1, 1, 8>}, {pipeline_mode = #tpu.pipeline_mode<synchronous>, transform_indices = @transform_2, window_bounds = array<i64: 32, 96>}, {pipeline_mode = #tpu.pipeline_mode<synchronous>, transform_indices = @transform_3, window_bounds = array<i64: 1, 96>}, {pipeline_mode = #tpu.pipeline_mode<synchronous>, transform_indices = @transform_4, window_bounds = array<i64: 32, 32>}, {pipeline_mode = #tpu.pipeline_mode<synchronous>, transform_indices = @transform_5, window_bounds = array<i64: 1, 32>}, {pipeline_mode = #tpu.pipeline_mode<synchronous>, transform_indices = @transform_6, window_bounds = array<i64: 1, 32>}, {pipeline_mode = #tpu.pipeline_mode<synchronous>, transform_indices = @transform_7, window_bounds = array<i64: 1, 32>}, {pipeline_mode = #tpu.pipeline_mode<synchronous>, transform_indices = @transform_8, window_bounds = array<i64: 32, 64>}, {pipeline_mode = #tpu.pipeline_mode<synchronous>, transform_indices = @transform_9, window_bounds = array<i64: 1, 64>}, {pipeline_mode = #tpu.pipeline_mode<synchronous>, transform_indices = @transform_10, window_bounds = array<i64: 64, 32>}, {pipeline_mode = #tpu.pipeline_mode<synchronous>, transform_indices = @transform_11, window_bounds = array<i64: 1, 32>}, {pipeline_mode = #tpu.pipeline_mode<synchronous>, transform_indices = @transform_12, window_bounds = array<i64: 1, 32>}, {pipeline_mode = #tpu.pipeline_mode<synchronous>, transform_indices = @transform_13, window_bounds = array<i64: 1, 32>}, {transform_indices = @transform_14, window_bounds = array<i64: 1, 8, 32>}]} {
    %c0 = arith.constant 0 : index
    %c0_0 = arith.constant 0 : index
    %c0_1 = arith.constant 0 : index
    %0 = vector.load %arg1[%c0, %c0_0, %c0_1] : memref<1x8x32xf32, #tpu.memory_space<vmem>>, vector<1x8x32xf32>
    %1 = vector.shape_cast %0 : vector<1x8x32xf32> to vector<8x32xf32>
    %c0_2 = arith.constant 0 : index
    %c0_3 = arith.constant 0 : index
    %c0_4 = arith.constant 0 : index
    %2 = vector.load %arg2[%c0_2, %c0_3, %c0_4] : memref<1x1x8xf32, #tpu.memory_space<vmem>>, vector<1x1x8xf32>
    %3 = vector.shape_cast %2 : vector<1x1x8xf32> to vector<1x8xf32>
    %c0_5 = arith.constant 0 : index
    %c0_6 = arith.constant 0 : index
    %4 = vector.load %arg3[%c0_5, %c0_6] : memref<32x96xbf16, #tpu.memory_space<vmem>>, vector<32x96xbf16>
    %c0_7 = arith.constant 0 : index
    %c0_8 = arith.constant 0 : index
    %5 = vector.load %arg4[%c0_7, %c0_8] : memref<1x96xf32, #tpu.memory_space<vmem>>, vector<1x96xf32>
    %c0_9 = arith.constant 0 : index
    %c0_10 = arith.constant 0 : index
    %6 = vector.load %arg5[%c0_9, %c0_10] : memref<32x32xbf16, #tpu.memory_space<vmem>>, vector<32x32xbf16>
    %c0_11 = arith.constant 0 : index
    %c0_12 = arith.constant 0 : index
    %7 = vector.load %arg6[%c0_11, %c0_12] : memref<1x32xf32, #tpu.memory_space<vmem>>, vector<1x32xf32>
    %8 = arith.truncf %1 : vector<8x32xf32> to vector<8x32xbf16>
    %cst = arith.constant dense<0.000000e+00> : vector<8x96xf32>
    %9 = tpu.matmul %8, %4, %cst {dimension_numbers = #tpu.dot_dimension_numbers<[1], [0], [0], [1], [0, 0, 1, 1], [], []>} : vector<8x32xbf16>, vector<32x96xbf16>, vector<8x96xf32> -> vector<8x96xf32>
    %10 = vector.broadcast %5 : vector<1x96xf32> to vector<8x96xf32>
    %11 = arith.addf %9, %10 : vector<8x96xf32>
    %12 = vector.extract_strided_slice %11 {offsets = [0, 0], sizes = [8, 32], strides = [1, 1]} : vector<8x96xf32> to vector<8x32xf32>
    %13 = vector.extract_strided_slice %11 {offsets = [0, 32], sizes = [8, 32], strides = [1, 1]} : vector<8x96xf32> to vector<8x32xf32>
    %14 = vector.extract_strided_slice %11 {offsets = [0, 64], sizes = [8, 32], strides = [1, 1]} : vector<8x96xf32> to vector<8x32xf32>
    %15 = vector.extract_strided_slice %12 {offsets = [0, 0], sizes = [8, 8], strides = [1, 1]} : vector<8x32xf32> to vector<8x8xf32>
    %16 = vector.extract_strided_slice %12 {offsets = [0, 8], sizes = [8, 8], strides = [1, 1]} : vector<8x32xf32> to vector<8x8xf32>
    %17 = vector.extract_strided_slice %12 {offsets = [0, 16], sizes = [8, 8], strides = [1, 1]} : vector<8x32xf32> to vector<8x8xf32>
    %18 = vector.extract_strided_slice %12 {offsets = [0, 24], sizes = [8, 8], strides = [1, 1]} : vector<8x32xf32> to vector<8x8xf32>
    %19 = vector.shape_cast %15 : vector<8x8xf32> to vector<1x8x8xf32>
    %20 = vector.shape_cast %16 : vector<8x8xf32> to vector<1x8x8xf32>
    %21 = vector.shape_cast %17 : vector<8x8xf32> to vector<1x8x8xf32>
    %22 = vector.shape_cast %18 : vector<8x8xf32> to vector<1x8x8xf32>
    %23 = tpu.concatenate %19, %20, %21, %22 in 0 : vector<1x8x8xf32>, vector<1x8x8xf32>, vector<1x8x8xf32>, vector<1x8x8xf32> -> vector<4x8x8xf32>
    %24 = vector.extract_strided_slice %13 {offsets = [0, 0], sizes = [8, 8], strides = [1, 1]} : vector<8x32xf32> to vector<8x8xf32>
    %25 = vector.extract_strided_slice %13 {offsets = [0, 8], sizes = [8, 8], strides = [1, 1]} : vector<8x32xf32> to vector<8x8xf32>
    %26 = vector.extract_strided_slice %13 {offsets = [0, 16], sizes = [8, 8], strides = [1, 1]} : vector<8x32xf32> to vector<8x8xf32>
    %27 = vector.extract_strided_slice %13 {offsets = [0, 24], sizes = [8, 8], strides = [1, 1]} : vector<8x32xf32> to vector<8x8xf32>
    %28 = vector.shape_cast %24 : vector<8x8xf32> to vector<1x8x8xf32>
    %29 = vector.shape_cast %25 : vector<8x8xf32> to vector<1x8x8xf32>
    %30 = vector.shape_cast %26 : vector<8x8xf32> to vector<1x8x8xf32>
    %31 = vector.shape_cast %27 : vector<8x8xf32> to vector<1x8x8xf32>
    %32 = tpu.concatenate %28, %29, %30, %31 in 0 : vector<1x8x8xf32>, vector<1x8x8xf32>, vector<1x8x8xf32>, vector<1x8x8xf32> -> vector<4x8x8xf32>
    %33 = vector.extract_strided_slice %14 {offsets = [0, 0], sizes = [8, 8], strides = [1, 1]} : vector<8x32xf32> to vector<8x8xf32>
    %34 = vector.extract_strided_slice %14 {offsets = [0, 8], sizes = [8, 8], strides = [1, 1]} : vector<8x32xf32> to vector<8x8xf32>
    %35 = vector.extract_strided_slice %14 {offsets = [0, 16], sizes = [8, 8], strides = [1, 1]} : vector<8x32xf32> to vector<8x8xf32>
    %36 = vector.extract_strided_slice %14 {offsets = [0, 24], sizes = [8, 8], strides = [1, 1]} : vector<8x32xf32> to vector<8x8xf32>
    %37 = vector.shape_cast %33 : vector<8x8xf32> to vector<1x8x8xf32>
    %38 = vector.shape_cast %34 : vector<8x8xf32> to vector<1x8x8xf32>
    %39 = vector.shape_cast %35 : vector<8x8xf32> to vector<1x8x8xf32>
    %40 = vector.shape_cast %36 : vector<8x8xf32> to vector<1x8x8xf32>
    %41 = tpu.concatenate %37, %38, %39, %40 in 0 : vector<1x8x8xf32>, vector<1x8x8xf32>, vector<1x8x8xf32>, vector<1x8x8xf32> -> vector<4x8x8xf32>
    %42 = arith.truncf %23 : vector<4x8x8xf32> to vector<4x8x8xbf16>
    %43 = arith.truncf %32 : vector<4x8x8xf32> to vector<4x8x8xbf16>
    "tpu.trace_start"() <{level = 10 : i32, message = "hqd,hkd->hqk"}> : () -> ()
    %cst_13 = arith.constant dense<0.000000e+00> : vector<4x8x8xf32>
    %44 = tpu.matmul %42, %43, %cst_13 {dimension_numbers = #tpu.dot_dimension_numbers<[2], [2], [1], [1], [0, 0, 0, 1, 1, 1], [0], [0]>} : vector<4x8x8xbf16>, vector<4x8x8xbf16>, vector<4x8x8xf32> -> vector<4x8x8xf32>
    "tpu.trace_stop"() : () -> ()
    %cst_14 = arith.constant 0.353553385 : f32
    %45 = vector.broadcast %cst_14 : f32 to vector<4x8x8xf32>
    %46 = arith.mulf %44, %45 : vector<4x8x8xf32>
    %47 = vector.shape_cast %3 : vector<1x8xf32> to vector<1x8xf32>
    %48 = vector.broadcast %47 : vector<1x8xf32> to vector<8x8xf32>
    %49 = vector.shape_cast %48 : vector<8x8xf32> to vector<1x8x8xf32>
    %50 = vector.broadcast %49 : vector<1x8x8xf32> to vector<4x8x8xf32>
    %51 = arith.addf %46, %50 : vector<4x8x8xf32>
    %cst_15 = arith.constant dense<0xFF800000> : vector<4x8xf32>
    %52 = vector.multi_reduction <maximumf>, %51, %cst_15 [2] : vector<4x8x8xf32> to vector<4x8xf32>
    %53 = vector.shape_cast %52 : vector<4x8xf32> to vector<4x8x1xf32>
    %54 = vector.broadcast %53 : vector<4x8x1xf32> to vector<4x8x8xf32>
    %55 = arith.subf %51, %54 : vector<4x8x8xf32>
    %56 = math.exp %55 : vector<4x8x8xf32>
    %cst_16 = arith.constant dense<0.000000e+00> : vector<4x8xf32>
    %57 = vector.multi_reduction <add>, %56, %cst_16 [2] : vector<4x8x8xf32> to vector<4x8xf32>
    %58 = vector.shape_cast %57 : vector<4x8xf32> to vector<4x8x1xf32>
    %59 = tpu.reciprocal %58 {approx = true} : vector<4x8x1xf32> -> vector<4x8x1xf32>
    %60 = vector.broadcast %59 : vector<4x8x1xf32> to vector<4x8x8xf32>
    %61 = arith.mulf %56, %60 : vector<4x8x8xf32>
    %62 = arith.truncf %61 : vector<4x8x8xf32> to vector<4x8x8xbf16>
    %63 = arith.truncf %41 : vector<4x8x8xf32> to vector<4x8x8xbf16>
    "tpu.trace_start"() <{level = 10 : i32, message = "hqk,hkd->hqd"}> : () -> ()
    %cst_17 = arith.constant dense<0.000000e+00> : vector<4x8x8xf32>
    %64 = tpu.matmul %62, %63, %cst_17 {dimension_numbers = #tpu.dot_dimension_numbers<[2], [1], [1], [2], [0, 0, 0, 1, 1, 2], [0], [0]>} : vector<4x8x8xbf16>, vector<4x8x8xbf16>, vector<4x8x8xf32> -> vector<4x8x8xf32>
    "tpu.trace_stop"() : () -> ()
    %65 = vector.extract_strided_slice %64 {offsets = [0, 0, 0], sizes = [1, 8, 8], strides = [1, 1, 1]} : vector<4x8x8xf32> to vector<1x8x8xf32>
    %66 = vector.shape_cast %65 : vector<1x8x8xf32> to vector<8x8xf32>
    %67 = vector.extract_strided_slice %64 {offsets = [1, 0, 0], sizes = [1, 8, 8], strides = [1, 1, 1]} : vector<4x8x8xf32> to vector<1x8x8xf32>
    %68 = vector.shape_cast %67 : vector<1x8x8xf32> to vector<8x8xf32>
    %69 = vector.extract_strided_slice %64 {offsets = [2, 0, 0], sizes = [1, 8, 8], strides = [1, 1, 1]} : vector<4x8x8xf32> to vector<1x8x8xf32>
    %70 = vector.shape_cast %69 : vector<1x8x8xf32> to vector<8x8xf32>
    %71 = vector.extract_strided_slice %64 {offsets = [3, 0, 0], sizes = [1, 8, 8], strides = [1, 1, 1]} : vector<4x8x8xf32> to vector<1x8x8xf32>
    %72 = vector.shape_cast %71 : vector<1x8x8xf32> to vector<8x8xf32>
    %73 = tpu.concatenate %66, %68, %70, %72 in 1 : vector<8x8xf32>, vector<8x8xf32>, vector<8x8xf32>, vector<8x8xf32> -> vector<8x32xf32>
    %74 = arith.truncf %73 : vector<8x32xf32> to vector<8x32xbf16>
    %cst_18 = arith.constant dense<0.000000e+00> : vector<8x32xf32>
    %75 = tpu.matmul %74, %6, %cst_18 {dimension_numbers = #tpu.dot_dimension_numbers<[1], [0], [0], [1], [0, 0, 1, 1], [], []>} : vector<8x32xbf16>, vector<32x32xbf16>, vector<8x32xf32> -> vector<8x32xf32>
    %76 = vector.broadcast %7 : vector<1x32xf32> to vector<8x32xf32>
    %77 = arith.addf %75, %76 : vector<8x32xf32>
    %78 = arith.addf %1, %77 : vector<8x32xf32>
    %c0_19 = arith.constant 0 : index
    %c0_20 = arith.constant 0 : index
    %79 = vector.load %arg7[%c0_19, %c0_20] : memref<1x32xf32, #tpu.memory_space<vmem>>, vector<1x32xf32>
    %c0_21 = arith.constant 0 : index
    %c0_22 = arith.constant 0 : index
    %80 = vector.load %arg8[%c0_21, %c0_22] : memref<1x32xf32, #tpu.memory_space<vmem>>, vector<1x32xf32>
    %cst_23 = arith.constant dense<0.000000e+00> : vector<8xf32>
    %81 = vector.multi_reduction <add>, %78, %cst_23 [1] : vector<8x32xf32> to vector<8xf32>
    %82 = vector.shape_cast %81 : vector<8xf32> to vector<8x1xf32>
    %cst_24 = arith.constant 3.200000e+01 : f32
    %83 = vector.broadcast %cst_24 : f32 to vector<8x1xf32>
    %84 = arith.divf %82, %83 : vector<8x1xf32>
    %85 = vector.broadcast %84 : vector<8x1xf32> to vector<8x32xf32>
    %86 = arith.subf %78, %85 : vector<8x32xf32>
    %87 = arith.mulf %86, %86 : vector<8x32xf32>
    %cst_25 = arith.constant dense<0.000000e+00> : vector<8xf32>
    %88 = vector.multi_reduction <add>, %87, %cst_25 [1] : vector<8x32xf32> to vector<8xf32>
    %89 = vector.shape_cast %88 : vector<8xf32> to vector<8x1xf32>
    %cst_26 = arith.constant 3.200000e+01 : f32
    %90 = vector.broadcast %cst_26 : f32 to vector<8x1xf32>
    %91 = arith.divf %89, %90 : vector<8x1xf32>
    %92 = vector.broadcast %84 : vector<8x1xf32> to vector<8x32xf32>
    %93 = arith.subf %78, %92 : vector<8x32xf32>
    %cst_27 = arith.constant 9.99999974E-6 : f32
    %94 = vector.broadcast %cst_27 : f32 to vector<8x1xf32>
    %95 = arith.addf %91, %94 : vector<8x1xf32>
    %96 = math.rsqrt %95 : vector<8x1xf32>
    %97 = vector.broadcast %96 : vector<8x1xf32> to vector<8x32xf32>
    %98 = arith.mulf %93, %97 : vector<8x32xf32>
    %99 = vector.broadcast %79 : vector<1x32xf32> to vector<8x32xf32>
    %100 = arith.mulf %98, %99 : vector<8x32xf32>
    %101 = vector.broadcast %80 : vector<1x32xf32> to vector<8x32xf32>
    %102 = arith.addf %100, %101 : vector<8x32xf32>
    %c0_28 = arith.constant 0 : index
    %c0_29 = arith.constant 0 : index
    %103 = vector.load %arg9[%c0_28, %c0_29] : memref<32x64xbf16, #tpu.memory_space<vmem>>, vector<32x64xbf16>
    %c0_30 = arith.constant 0 : index
    %c0_31 = arith.constant 0 : index
    %104 = vector.load %arg10[%c0_30, %c0_31] : memref<1x64xf32, #tpu.memory_space<vmem>>, vector<1x64xf32>
    %c0_32 = arith.constant 0 : index
    %c0_33 = arith.constant 0 : index
    %105 = vector.load %arg11[%c0_32, %c0_33] : memref<64x32xbf16, #tpu.memory_space<vmem>>, vector<64x32xbf16>
    %c0_34 = arith.constant 0 : index
    %c0_35 = arith.constant 0 : index
    %106 = vector.load %arg12[%c0_34, %c0_35] : memref<1x32xf32, #tpu.memory_space<vmem>>, vector<1x32xf32>
    %107 = arith.truncf %102 : vector<8x32xf32> to vector<8x32xbf16>
    %cst_36 = arith.constant dense<0.000000e+00> : vector<8x64xf32>
    %108 = tpu.matmul %107, %103, %cst_36 {dimension_numbers = #tpu.dot_dimension_numbers<[1], [0], [0], [1], [0, 0, 1, 1], [], []>} : vector<8x32xbf16>, vector<32x64xbf16>, vector<8x64xf32> -> vector<8x64xf32>
    %109 = vector.broadcast %104 : vector<1x64xf32> to vector<8x64xf32>
    %110 = arith.addf %108, %109 : vector<8x64xf32>
    %cst_37 = arith.constant 0.000000e+00 : f32
    %111 = vector.broadcast %cst_37 : f32 to vector<8x64xf32>
    %112 = arith.maximumf %110, %111 : vector<8x64xf32>
    %113 = arith.truncf %112 : vector<8x64xf32> to vector<8x64xbf16>
    %cst_38 = arith.constant dense<0.000000e+00> : vector<8x32xf32>
    %114 = tpu.matmul %113, %105, %cst_38 {dimension_numbers = #tpu.dot_dimension_numbers<[1], [0], [0], [1], [0, 0, 1, 1], [], []>} : vector<8x64xbf16>, vector<64x32xbf16>, vector<8x32xf32> -> vector<8x32xf32>
    %115 = vector.broadcast %106 : vector<1x32xf32> to vector<8x32xf32>
    %116 = arith.addf %114, %115 : vector<8x32xf32>
    %117 = arith.addf %102, %116 : vector<8x32xf32>
    %c0_39 = arith.constant 0 : index
    %c0_40 = arith.constant 0 : index
    %118 = vector.load %arg13[%c0_39, %c0_40] : memref<1x32xf32, #tpu.memory_space<vmem>>, vector<1x32xf32>
    %c0_41 = arith.constant 0 : index
    %c0_42 = arith.constant 0 : index
    %119 = vector.load %arg14[%c0_41, %c0_42] : memref<1x32xf32, #tpu.memory_space<vmem>>, vector<1x32xf32>
    %cst_43 = arith.constant dense<0.000000e+00> : vector<8xf32>
    %120 = vector.multi_reduction <add>, %117, %cst_43 [1] : vector<8x32xf32> to vector<8xf32>
    %121 = vector.shape_cast %120 : vector<8xf32> to vector<8x1xf32>
    %cst_44 = arith.constant 3.200000e+01 : f32
    %122 = vector.broadcast %cst_44 : f32 to vector<8x1xf32>
    %123 = arith.divf %121, %122 : vector<8x1xf32>
    %124 = vector.broadcast %123 : vector<8x1xf32> to vector<8x32xf32>
    %125 = arith.subf %117, %124 : vector<8x32xf32>
    %126 = arith.mulf %125, %125 : vector<8x32xf32>
    %cst_45 = arith.constant dense<0.000000e+00> : vector<8xf32>
    %127 = vector.multi_reduction <add>, %126, %cst_45 [1] : vector<8x32xf32> to vector<8xf32>
    %128 = vector.shape_cast %127 : vector<8xf32> to vector<8x1xf32>
    %cst_46 = arith.constant 3.200000e+01 : f32
    %129 = vector.broadcast %cst_46 : f32 to vector<8x1xf32>
    %130 = arith.divf %128, %129 : vector<8x1xf32>
    %131 = vector.broadcast %123 : vector<8x1xf32> to vector<8x32xf32>
    %132 = arith.subf %117, %131 : vector<8x32xf32>
    %cst_47 = arith.constant 9.99999974E-6 : f32
    %133 = vector.broadcast %cst_47 : f32 to vector<8x1xf32>
    %134 = arith.addf %130, %133 : vector<8x1xf32>
    %135 = math.rsqrt %134 : vector<8x1xf32>
    %136 = vector.broadcast %135 : vector<8x1xf32> to vector<8x32xf32>
    %137 = arith.mulf %132, %136 : vector<8x32xf32>
    %138 = vector.broadcast %118 : vector<1x32xf32> to vector<8x32xf32>
    %139 = arith.mulf %137, %138 : vector<8x32xf32>
    %140 = vector.broadcast %119 : vector<1x32xf32> to vector<8x32xf32>
    %141 = arith.addf %139, %140 : vector<8x32xf32>
    %c0_48 = arith.constant 0 : index
    %c0_49 = arith.constant 0 : index
    %c0_50 = arith.constant 0 : index
    %142 = vector.load %arg15[%c0_48, %c0_49, %c0_50] : memref<1x8x32xf32, #tpu.memory_space<vmem>>, vector<1x8x32xf32>
    %143 = vector.shape_cast %142 : vector<1x8x32xf32> to vector<8x32xf32>
    %144 = vector.shape_cast %141 : vector<8x32xf32> to vector<1x8x32xf32>
    tpu.vector_store %arg15[%c0_48, %c0_49, %c0_50], %144 {strides = array<i32>} : memref<1x8x32xf32, #tpu.memory_space<vmem>>, vector<1x8x32xf32>,
    return
  }
  func.func @transform_0(%arg0: i32) -> (i32, i32, i32) {
    %c0_i32 = arith.constant 0 : i32
    %c0_i32_0 = arith.constant 0 : i32
    %c0_i32_1 = arith.constant 0 : i32
    return %arg0, %c0_i32, %c0_i32_0 : i32, i32, i32
  }
  func.func @transform_1(%arg0: i32) -> (i32, i32, i32) {
    %c0_i32 = arith.constant 0 : i32
    %c0_i32_0 = arith.constant 0 : i32
    %c0_i32_1 = arith.constant 0 : i32
    return %arg0, %c0_i32, %c0_i32_0 : i32, i32, i32
  }
  func.func @transform_2(%arg0: i32) -> (i32, i32) {
    %c0_i32 = arith.constant 0 : i32
    %c0_i32_0 = arith.constant 0 : i32
    %c0_i32_1 = arith.constant 0 : i32
    return %c0_i32, %c0_i32_0 : i32, i32
  }
  func.func @transform_3(%arg0: i32) -> (i32, i32) {
    %c0_i32 = arith.constant 0 : i32
    %c0_i32_0 = arith.constant 0 : i32
    %c0_i32_1 = arith.constant 0 : i32
    return %c0_i32, %c0_i32_0 : i32, i32
  }
  func.func @transform_4(%arg0: i32) -> (i32, i32) {
    %c0_i32 = arith.constant 0 : i32
    %c0_i32_0 = arith.constant 0 : i32
    %c0_i32_1 = arith.constant 0 : i32
    return %c0_i32, %c0_i32_0 : i32, i32
  }
  func.func @transform_5(%arg0: i32) -> (i32, i32) {
    %c0_i32 = arith.constant 0 : i32
    %c0_i32_0 = arith.constant 0 : i32
    %c0_i32_1 = arith.constant 0 : i32
    return %c0_i32, %c0_i32_0 : i32, i32
  }
  func.func @transform_6(%arg0: i32) -> (i32, i32) {
    %c0_i32 = arith.constant 0 : i32
    %c0_i32_0 = arith.constant 0 : i32
    %c0_i32_1 = arith.constant 0 : i32
    return %c0_i32, %c0_i32_0 : i32, i32
  }
  func.func @transform_7(%arg0: i32) -> (i32, i32) {
    %c0_i32 = arith.constant 0 : i32
    %c0_i32_0 = arith.constant 0 : i32
    %c0_i32_1 = arith.constant 0 : i32
    return %c0_i32, %c0_i32_0 : i32, i32
  }
  func.func @transform_8(%arg0: i32) -> (i32, i32) {
    %c0_i32 = arith.constant 0 : i32
    %c0_i32_0 = arith.constant 0 : i32
    %c0_i32_1 = arith.constant 0 : i32
    return %c0_i32, %c0_i32_0 : i32, i32
  }
  func.func @transform_9(%arg0: i32) -> (i32, i32) {
    %c0_i32 = arith.constant 0 : i32
    %c0_i32_0 = arith.constant 0 : i32
    %c0_i32_1 = arith.constant 0 : i32
    return %c0_i32, %c0_i32_0 : i32, i32
  }
  func.func @transform_10(%arg0: i32) -> (i32, i32) {
    %c0_i32 = arith.constant 0 : i32
    %c0_i32_0 = arith.constant 0 : i32
    %c0_i32_1 = arith.constant 0 : i32
    return %c0_i32, %c0_i32_0 : i32, i32
  }
  func.func @transform_11(%arg0: i32) -> (i32, i32) {
    %c0_i32 = arith.constant 0 : i32
    %c0_i32_0 = arith.constant 0 : i32
    %c0_i32_1 = arith.constant 0 : i32
    return %c0_i32, %c0_i32_0 : i32, i32
  }
  func.func @transform_12(%arg0: i32) -> (i32, i32) {
    %c0_i32 = arith.constant 0 : i32
    %c0_i32_0 = arith.constant 0 : i32
    %c0_i32_1 = arith.constant 0 : i32
    return %c0_i32, %c0_i32_0 : i32, i32
  }
  func.func @transform_13(%arg0: i32) -> (i32, i32) {
    %c0_i32 = arith.constant 0 : i32
    %c0_i32_0 = arith.constant 0 : i32
    %c0_i32_1 = arith.constant 0 : i32
    return %c0_i32, %c0_i32_0 : i32, i32
  }
  func.func @transform_14(%arg0: i32) -> (i32, i32, i32) {
    %c0_i32 = arith.constant 0 : i32
    %c0_i32_0 = arith.constant 0 : i32
    %c0_i32_1 = arith.constant 0 : i32
    return %arg0, %c0_i32, %c0_i32_0 : i32, i32, i32
  }
}

module attributes {stable_mosaic.version = 11 : i64} {
  func.func @_decoder_kernel(%arg0: i32, %arg1: memref<1x8x32xf32, #tpu.memory_space<vmem>>, %arg2: memref<1x8x32xf32, #tpu.memory_space<vmem>>, %arg3: memref<1x1x8xf32, #tpu.memory_space<vmem>>, %arg4: memref<1x8x8xf32, #tpu.memory_space<vmem>>, %arg5: memref<32x96xbf16, #tpu.memory_space<vmem>>, %arg6: memref<1x96xf32, #tpu.memory_space<vmem>>, %arg7: memref<32x32xbf16, #tpu.memory_space<vmem>>, %arg8: memref<1x32xf32, #tpu.memory_space<vmem>>, %arg9: memref<1x32xf32, #tpu.memory_space<vmem>>, %arg10: memref<1x32xf32, #tpu.memory_space<vmem>>, %arg11: memref<32x32xbf16, #tpu.memory_space<vmem>>, %arg12: memref<1x32xf32, #tpu.memory_space<vmem>>, %arg13: memref<32x64xbf16, #tpu.memory_space<vmem>>, %arg14: memref<1x64xf32, #tpu.memory_space<vmem>>, %arg15: memref<32x32xbf16, #tpu.memory_space<vmem>>, %arg16: memref<1x32xf32, #tpu.memory_space<vmem>>, %arg17: memref<1x32xf32, #tpu.memory_space<vmem>>, %arg18: memref<1x32xf32, #tpu.memory_space<vmem>>, %arg19: memref<32x64xbf16, #tpu.memory_space<vmem>>, %arg20: memref<1x64xf32, #tpu.memory_space<vmem>>, %arg21: memref<64x32xbf16, #tpu.memory_space<vmem>>, %arg22: memref<1x32xf32, #tpu.memory_space<vmem>>, %arg23: memref<1x32xf32, #tpu.memory_space<vmem>>, %arg24: memref<1x32xf32, #tpu.memory_space<vmem>>, %arg25: memref<32x16xbf16, #tpu.memory_space<vmem>>, %arg26: memref<1x16xf32, #tpu.memory_space<vmem>>, %arg27: memref<1x8x16xf32, #tpu.memory_space<vmem>>) attributes {dimension_semantics = [#tpu.dimension_semantics<parallel>], iteration_bounds = array<i64: 2>, scalar_prefetch = 0 : i64, scratch_operands = 0 : i64, tpu.core_type = #tpu.core_type<tc>, window_params = [{transform_indices = @transform_0, window_bounds = array<i64: 1, 8, 32>}, {transform_indices = @transform_1, window_bounds = array<i64: 1, 8, 32>}, {transform_indices = @transform_2, window_bounds = array<i64: 1, 1, 8>}, {transform_indices = @transform_3, window_bounds = array<i64: 1, 8, 8>}, {pipeline_mode = #tpu.pipeline_mode<synchronous>, transform_indices = @transform_4, window_bounds = array<i64: 32, 96>}, {pipeline_mode = #tpu.pipeline_mode<synchronous>, transform_indices = @transform_5, window_bounds = array<i64: 1, 96>}, {pipeline_mode = #tpu.pipeline_mode<synchronous>, transform_indices = @transform_6, window_bounds = array<i64: 32, 32>}, {pipeline_mode = #tpu.pipeline_mode<synchronous>, transform_indices = @transform_7, window_bounds = array<i64: 1, 32>}, {pipeline_mode = #tpu.pipeline_mode<synchronous>, transform_indices = @transform_8, window_bounds = array<i64: 1, 32>}, {pipeline_mode = #tpu.pipeline_mode<synchronous>, transform_indices = @transform_9, window_bounds = array<i64: 1, 32>}, {pipeline_mode = #tpu.pipeline_mode<synchronous>, transform_indices = @transform_10, window_bounds = array<i64: 32, 32>}, {pipeline_mode = #tpu.pipeline_mode<synchronous>, transform_indices = @transform_11, window_bounds = array<i64: 1, 32>}, {pipeline_mode = #tpu.pipeline_mode<synchronous>, transform_indices = @transform_12, window_bounds = array<i64: 32, 64>}, {pipeline_mode = #tpu.pipeline_mode<synchronous>, transform_indices = @transform_13, window_bounds = array<i64: 1, 64>}, {pipeline_mode = #tpu.pipeline_mode<synchronous>, transform_indices = @transform_14, window_bounds = array<i64: 32, 32>}, {pipeline_mode = #tpu.pipeline_mode<synchronous>, transform_indices = @transform_15, window_bounds = array<i64: 1, 32>}, {pipeline_mode = #tpu.pipeline_mode<synchronous>, transform_indices = @transform_16, window_bounds = array<i64: 1, 32>}, {pipeline_mode = #tpu.pipeline_mode<synchronous>, transform_indices = @transform_17, window_bounds = array<i64: 1, 32>}, {pipeline_mode = #tpu.pipeline_mode<synchronous>, transform_indices = @transform_18, window_bounds = array<i64: 32, 64>}, {pipeline_mode = #tpu.pipeline_mode<synchronous>, transform_indices = @transform_19, window_bounds = array<i64: 1, 64>}, {pipeline_mode = #tpu.pipeline_mode<synchronous>, transform_indices = @transform_20, window_bounds = array<i64: 64, 32>}, {pipeline_mode = #tpu.pipeline_mode<synchronous>, transform_indices = @transform_21, window_bounds = array<i64: 1, 32>}, {pipeline_mode = #tpu.pipeline_mode<synchronous>, transform_indices = @transform_22, window_bounds = array<i64: 1, 32>}, {pipeline_mode = #tpu.pipeline_mode<synchronous>, transform_indices = @transform_23, window_bounds = array<i64: 1, 32>}, {pipeline_mode = #tpu.pipeline_mode<synchronous>, transform_indices = @transform_24, window_bounds = array<i64: 32, 16>}, {pipeline_mode = #tpu.pipeline_mode<synchronous>, transform_indices = @transform_25, window_bounds = array<i64: 1, 16>}, {transform_indices = @transform_26, window_bounds = array<i64: 1, 8, 16>}]} {
    %c0 = arith.constant 0 : index
    %c0_0 = arith.constant 0 : index
    %c0_1 = arith.constant 0 : index
    %0 = vector.load %arg1[%c0, %c0_0, %c0_1] : memref<1x8x32xf32, #tpu.memory_space<vmem>>, vector<1x8x32xf32>
    %1 = vector.shape_cast %0 : vector<1x8x32xf32> to vector<8x32xf32>
    %c0_2 = arith.constant 0 : index
    %c0_3 = arith.constant 0 : index
    %c0_4 = arith.constant 0 : index
    %2 = vector.load %arg2[%c0_2, %c0_3, %c0_4] : memref<1x8x32xf32, #tpu.memory_space<vmem>>, vector<1x8x32xf32>
    %3 = vector.shape_cast %2 : vector<1x8x32xf32> to vector<8x32xf32>
    %c0_5 = arith.constant 0 : index
    %c0_6 = arith.constant 0 : index
    %c0_7 = arith.constant 0 : index
    %4 = vector.load %arg3[%c0_5, %c0_6, %c0_7] : memref<1x1x8xf32, #tpu.memory_space<vmem>>, vector<1x1x8xf32>
    %5 = vector.shape_cast %4 : vector<1x1x8xf32> to vector<1x8xf32>
    %c0_8 = arith.constant 0 : index
    %c0_9 = arith.constant 0 : index
    %c0_10 = arith.constant 0 : index
    %6 = vector.load %arg4[%c0_8, %c0_9, %c0_10] : memref<1x8x8xf32, #tpu.memory_space<vmem>>, vector<1x8x8xf32>
    %7 = vector.shape_cast %6 : vector<1x8x8xf32> to vector<8x8xf32>
    %c0_11 = arith.constant 0 : index
    %c0_12 = arith.constant 0 : index
    %8 = vector.load %arg5[%c0_11, %c0_12] : memref<32x96xbf16, #tpu.memory_space<vmem>>, vector<32x96xbf16>
    %c0_13 = arith.constant 0 : index
    %c0_14 = arith.constant 0 : index
    %9 = vector.load %arg6[%c0_13, %c0_14] : memref<1x96xf32, #tpu.memory_space<vmem>>, vector<1x96xf32>
    %c0_15 = arith.constant 0 : index
    %c0_16 = arith.constant 0 : index
    %10 = vector.load %arg7[%c0_15, %c0_16] : memref<32x32xbf16, #tpu.memory_space<vmem>>, vector<32x32xbf16>
    %c0_17 = arith.constant 0 : index
    %c0_18 = arith.constant 0 : index
    %11 = vector.load %arg8[%c0_17, %c0_18] : memref<1x32xf32, #tpu.memory_space<vmem>>, vector<1x32xf32>
    %12 = arith.truncf %1 : vector<8x32xf32> to vector<8x32xbf16>
    %cst = arith.constant dense<0.000000e+00> : vector<8x96xf32>
    %13 = tpu.matmul %12, %8, %cst {dimension_numbers = #tpu.dot_dimension_numbers<[1], [0], [0], [1], [0, 0, 1, 1], [], []>} : vector<8x32xbf16>, vector<32x96xbf16>, vector<8x96xf32> -> vector<8x96xf32>
    %14 = vector.broadcast %9 : vector<1x96xf32> to vector<8x96xf32>
    %15 = arith.addf %13, %14 : vector<8x96xf32>
    %16 = vector.extract_strided_slice %15 {offsets = [0, 0], sizes = [8, 32], strides = [1, 1]} : vector<8x96xf32> to vector<8x32xf32>
    %17 = vector.extract_strided_slice %15 {offsets = [0, 32], sizes = [8, 32], strides = [1, 1]} : vector<8x96xf32> to vector<8x32xf32>
    %18 = vector.extract_strided_slice %15 {offsets = [0, 64], sizes = [8, 32], strides = [1, 1]} : vector<8x96xf32> to vector<8x32xf32>
    %19 = vector.extract_strided_slice %16 {offsets = [0, 0], sizes = [8, 8], strides = [1, 1]} : vector<8x32xf32> to vector<8x8xf32>
    %20 = vector.extract_strided_slice %16 {offsets = [0, 8], sizes = [8, 8], strides = [1, 1]} : vector<8x32xf32> to vector<8x8xf32>
    %21 = vector.extract_strided_slice %16 {offsets = [0, 16], sizes = [8, 8], strides = [1, 1]} : vector<8x32xf32> to vector<8x8xf32>
    %22 = vector.extract_strided_slice %16 {offsets = [0, 24], sizes = [8, 8], strides = [1, 1]} : vector<8x32xf32> to vector<8x8xf32>
    %23 = vector.shape_cast %19 : vector<8x8xf32> to vector<1x8x8xf32>
    %24 = vector.shape_cast %20 : vector<8x8xf32> to vector<1x8x8xf32>
    %25 = vector.shape_cast %21 : vector<8x8xf32> to vector<1x8x8xf32>
    %26 = vector.shape_cast %22 : vector<8x8xf32> to vector<1x8x8xf32>
    %27 = tpu.concatenate %23, %24, %25, %26 in 0 : vector<1x8x8xf32>, vector<1x8x8xf32>, vector<1x8x8xf32>, vector<1x8x8xf32> -> vector<4x8x8xf32>
    %28 = vector.extract_strided_slice %17 {offsets = [0, 0], sizes = [8, 8], strides = [1, 1]} : vector<8x32xf32> to vector<8x8xf32>
    %29 = vector.extract_strided_slice %17 {offsets = [0, 8], sizes = [8, 8], strides = [1, 1]} : vector<8x32xf32> to vector<8x8xf32>
    %30 = vector.extract_strided_slice %17 {offsets = [0, 16], sizes = [8, 8], strides = [1, 1]} : vector<8x32xf32> to vector<8x8xf32>
    %31 = vector.extract_strided_slice %17 {offsets = [0, 24], sizes = [8, 8], strides = [1, 1]} : vector<8x32xf32> to vector<8x8xf32>
    %32 = vector.shape_cast %28 : vector<8x8xf32> to vector<1x8x8xf32>
    %33 = vector.shape_cast %29 : vector<8x8xf32> to vector<1x8x8xf32>
    %34 = vector.shape_cast %30 : vector<8x8xf32> to vector<1x8x8xf32>
    %35 = vector.shape_cast %31 : vector<8x8xf32> to vector<1x8x8xf32>
    %36 = tpu.concatenate %32, %33, %34, %35 in 0 : vector<1x8x8xf32>, vector<1x8x8xf32>, vector<1x8x8xf32>, vector<1x8x8xf32> -> vector<4x8x8xf32>
    %37 = vector.extract_strided_slice %18 {offsets = [0, 0], sizes = [8, 8], strides = [1, 1]} : vector<8x32xf32> to vector<8x8xf32>
    %38 = vector.extract_strided_slice %18 {offsets = [0, 8], sizes = [8, 8], strides = [1, 1]} : vector<8x32xf32> to vector<8x8xf32>
    %39 = vector.extract_strided_slice %18 {offsets = [0, 16], sizes = [8, 8], strides = [1, 1]} : vector<8x32xf32> to vector<8x8xf32>
    %40 = vector.extract_strided_slice %18 {offsets = [0, 24], sizes = [8, 8], strides = [1, 1]} : vector<8x32xf32> to vector<8x8xf32>
    %41 = vector.shape_cast %37 : vector<8x8xf32> to vector<1x8x8xf32>
    %42 = vector.shape_cast %38 : vector<8x8xf32> to vector<1x8x8xf32>
    %43 = vector.shape_cast %39 : vector<8x8xf32> to vector<1x8x8xf32>
    %44 = vector.shape_cast %40 : vector<8x8xf32> to vector<1x8x8xf32>
    %45 = tpu.concatenate %41, %42, %43, %44 in 0 : vector<1x8x8xf32>, vector<1x8x8xf32>, vector<1x8x8xf32>, vector<1x8x8xf32> -> vector<4x8x8xf32>
    %46 = arith.truncf %27 : vector<4x8x8xf32> to vector<4x8x8xbf16>
    %47 = arith.truncf %36 : vector<4x8x8xf32> to vector<4x8x8xbf16>
    "tpu.trace_start"() <{level = 10 : i32, message = "hqd,hkd->hqk"}> : () -> ()
    %cst_19 = arith.constant dense<0.000000e+00> : vector<4x8x8xf32>
    %48 = tpu.matmul %46, %47, %cst_19 {dimension_numbers = #tpu.dot_dimension_numbers<[2], [2], [1], [1], [0, 0, 0, 1, 1, 1], [0], [0]>} : vector<4x8x8xbf16>, vector<4x8x8xbf16>, vector<4x8x8xf32> -> vector<4x8x8xf32>
    "tpu.trace_stop"() : () -> ()
    %cst_20 = arith.constant 0.353553385 : f32
    %49 = vector.broadcast %cst_20 : f32 to vector<4x8x8xf32>
    %50 = arith.mulf %48, %49 : vector<4x8x8xf32>
    %51 = vector.shape_cast %7 : vector<8x8xf32> to vector<1x8x8xf32>
    %52 = vector.broadcast %51 : vector<1x8x8xf32> to vector<4x8x8xf32>
    %53 = arith.addf %50, %52 : vector<4x8x8xf32>
    %cst_21 = arith.constant dense<0xFF800000> : vector<4x8xf32>
    %54 = vector.multi_reduction <maximumf>, %53, %cst_21 [2] : vector<4x8x8xf32> to vector<4x8xf32>
    %55 = vector.shape_cast %54 : vector<4x8xf32> to vector<4x8x1xf32>
    %56 = vector.broadcast %55 : vector<4x8x1xf32> to vector<4x8x8xf32>
    %57 = arith.subf %53, %56 : vector<4x8x8xf32>
    %58 = math.exp %57 : vector<4x8x8xf32>
    %cst_22 = arith.constant dense<0.000000e+00> : vector<4x8xf32>
    %59 = vector.multi_reduction <add>, %58, %cst_22 [2] : vector<4x8x8xf32> to vector<4x8xf32>
    %60 = vector.shape_cast %59 : vector<4x8xf32> to vector<4x8x1xf32>
    %61 = tpu.reciprocal %60 {approx = true} : vector<4x8x1xf32> -> vector<4x8x1xf32>
    %62 = vector.broadcast %61 : vector<4x8x1xf32> to vector<4x8x8xf32>
    %63 = arith.mulf %58, %62 : vector<4x8x8xf32>
    %64 = arith.truncf %63 : vector<4x8x8xf32> to vector<4x8x8xbf16>
    %65 = arith.truncf %45 : vector<4x8x8xf32> to vector<4x8x8xbf16>
    "tpu.trace_start"() <{level = 10 : i32, message = "hqk,hkd->hqd"}> : () -> ()
    %cst_23 = arith.constant dense<0.000000e+00> : vector<4x8x8xf32>
    %66 = tpu.matmul %64, %65, %cst_23 {dimension_numbers = #tpu.dot_dimension_numbers<[2], [1], [1], [2], [0, 0, 0, 1, 1, 2], [0], [0]>} : vector<4x8x8xbf16>, vector<4x8x8xbf16>, vector<4x8x8xf32> -> vector<4x8x8xf32>
    "tpu.trace_stop"() : () -> ()
    %67 = vector.extract_strided_slice %66 {offsets = [0, 0, 0], sizes = [1, 8, 8], strides = [1, 1, 1]} : vector<4x8x8xf32> to vector<1x8x8xf32>
    %68 = vector.shape_cast %67 : vector<1x8x8xf32> to vector<8x8xf32>
    %69 = vector.extract_strided_slice %66 {offsets = [1, 0, 0], sizes = [1, 8, 8], strides = [1, 1, 1]} : vector<4x8x8xf32> to vector<1x8x8xf32>
    %70 = vector.shape_cast %69 : vector<1x8x8xf32> to vector<8x8xf32>
    %71 = vector.extract_strided_slice %66 {offsets = [2, 0, 0], sizes = [1, 8, 8], strides = [1, 1, 1]} : vector<4x8x8xf32> to vector<1x8x8xf32>
    %72 = vector.shape_cast %71 : vector<1x8x8xf32> to vector<8x8xf32>
    %73 = vector.extract_strided_slice %66 {offsets = [3, 0, 0], sizes = [1, 8, 8], strides = [1, 1, 1]} : vector<4x8x8xf32> to vector<1x8x8xf32>
    %74 = vector.shape_cast %73 : vector<1x8x8xf32> to vector<8x8xf32>
    %75 = tpu.concatenate %68, %70, %72, %74 in 1 : vector<8x8xf32>, vector<8x8xf32>, vector<8x8xf32>, vector<8x8xf32> -> vector<8x32xf32>
    %76 = arith.truncf %75 : vector<8x32xf32> to vector<8x32xbf16>
    %cst_24 = arith.constant dense<0.000000e+00> : vector<8x32xf32>
    %77 = tpu.matmul %76, %10, %cst_24 {dimension_numbers = #tpu.dot_dimension_numbers<[1], [0], [0], [1], [0, 0, 1, 1], [], []>} : vector<8x32xbf16>, vector<32x32xbf16>, vector<8x32xf32> -> vector<8x32xf32>
    %78 = vector.broadcast %11 : vector<1x32xf32> to vector<8x32xf32>
    %79 = arith.addf %77, %78 : vector<8x32xf32>
    %80 = arith.addf %1, %79 : vector<8x32xf32>
    %c0_25 = arith.constant 0 : index
    %c0_26 = arith.constant 0 : index
    %81 = vector.load %arg9[%c0_25, %c0_26] : memref<1x32xf32, #tpu.memory_space<vmem>>, vector<1x32xf32>
    %c0_27 = arith.constant 0 : index
    %c0_28 = arith.constant 0 : index
    %82 = vector.load %arg10[%c0_27, %c0_28] : memref<1x32xf32, #tpu.memory_space<vmem>>, vector<1x32xf32>
    %cst_29 = arith.constant dense<0.000000e+00> : vector<8xf32>
    %83 = vector.multi_reduction <add>, %80, %cst_29 [1] : vector<8x32xf32> to vector<8xf32>
    %84 = vector.shape_cast %83 : vector<8xf32> to vector<8x1xf32>
    %cst_30 = arith.constant 3.200000e+01 : f32
    %85 = vector.broadcast %cst_30 : f32 to vector<8x1xf32>
    %86 = arith.divf %84, %85 : vector<8x1xf32>
    %87 = vector.broadcast %86 : vector<8x1xf32> to vector<8x32xf32>
    %88 = arith.subf %80, %87 : vector<8x32xf32>
    %89 = arith.mulf %88, %88 : vector<8x32xf32>
    %cst_31 = arith.constant dense<0.000000e+00> : vector<8xf32>
    %90 = vector.multi_reduction <add>, %89, %cst_31 [1] : vector<8x32xf32> to vector<8xf32>
    %91 = vector.shape_cast %90 : vector<8xf32> to vector<8x1xf32>
    %cst_32 = arith.constant 3.200000e+01 : f32
    %92 = vector.broadcast %cst_32 : f32 to vector<8x1xf32>
    %93 = arith.divf %91, %92 : vector<8x1xf32>
    %94 = vector.broadcast %86 : vector<8x1xf32> to vector<8x32xf32>
    %95 = arith.subf %80, %94 : vector<8x32xf32>
    %cst_33 = arith.constant 9.99999974E-6 : f32
    %96 = vector.broadcast %cst_33 : f32 to vector<8x1xf32>
    %97 = arith.addf %93, %96 : vector<8x1xf32>
    %98 = math.rsqrt %97 : vector<8x1xf32>
    %99 = vector.broadcast %98 : vector<8x1xf32> to vector<8x32xf32>
    %100 = arith.mulf %95, %99 : vector<8x32xf32>
    %101 = vector.broadcast %81 : vector<1x32xf32> to vector<8x32xf32>
    %102 = arith.mulf %100, %101 : vector<8x32xf32>
    %103 = vector.broadcast %82 : vector<1x32xf32> to vector<8x32xf32>
    %104 = arith.addf %102, %103 : vector<8x32xf32>
    %c0_34 = arith.constant 0 : index
    %c0_35 = arith.constant 0 : index
    %105 = vector.load %arg11[%c0_34, %c0_35] : memref<32x32xbf16, #tpu.memory_space<vmem>>, vector<32x32xbf16>
    %c0_36 = arith.constant 0 : index
    %c0_37 = arith.constant 0 : index
    %106 = vector.load %arg12[%c0_36, %c0_37] : memref<1x32xf32, #tpu.memory_space<vmem>>, vector<1x32xf32>
    %c0_38 = arith.constant 0 : index
    %c0_39 = arith.constant 0 : index
    %107 = vector.load %arg13[%c0_38, %c0_39] : memref<32x64xbf16, #tpu.memory_space<vmem>>, vector<32x64xbf16>
    %c0_40 = arith.constant 0 : index
    %c0_41 = arith.constant 0 : index
    %108 = vector.load %arg14[%c0_40, %c0_41] : memref<1x64xf32, #tpu.memory_space<vmem>>, vector<1x64xf32>
    %c0_42 = arith.constant 0 : index
    %c0_43 = arith.constant 0 : index
    %109 = vector.load %arg15[%c0_42, %c0_43] : memref<32x32xbf16, #tpu.memory_space<vmem>>, vector<32x32xbf16>
    %c0_44 = arith.constant 0 : index
    %c0_45 = arith.constant 0 : index
    %110 = vector.load %arg16[%c0_44, %c0_45] : memref<1x32xf32, #tpu.memory_space<vmem>>, vector<1x32xf32>
    %111 = arith.truncf %104 : vector<8x32xf32> to vector<8x32xbf16>
    %cst_46 = arith.constant dense<0.000000e+00> : vector<8x32xf32>
    %112 = tpu.matmul %111, %105, %cst_46 {dimension_numbers = #tpu.dot_dimension_numbers<[1], [0], [0], [1], [0, 0, 1, 1], [], []>} : vector<8x32xbf16>, vector<32x32xbf16>, vector<8x32xf32> -> vector<8x32xf32>
    %113 = vector.broadcast %106 : vector<1x32xf32> to vector<8x32xf32>
    %114 = arith.addf %112, %113 : vector<8x32xf32>
    %115 = arith.truncf %3 : vector<8x32xf32> to vector<8x32xbf16>
    %cst_47 = arith.constant dense<0.000000e+00> : vector<8x64xf32>
    %116 = tpu.matmul %115, %107, %cst_47 {dimension_numbers = #tpu.dot_dimension_numbers<[1], [0], [0], [1], [0, 0, 1, 1], [], []>} : vector<8x32xbf16>, vector<32x64xbf16>, vector<8x64xf32> -> vector<8x64xf32>
    %117 = vector.broadcast %108 : vector<1x64xf32> to vector<8x64xf32>
    %118 = arith.addf %116, %117 : vector<8x64xf32>
    %119 = vector.extract_strided_slice %118 {offsets = [0, 0], sizes = [8, 32], strides = [1, 1]} : vector<8x64xf32> to vector<8x32xf32>
    %120 = vector.extract_strided_slice %118 {offsets = [0, 32], sizes = [8, 32], strides = [1, 1]} : vector<8x64xf32> to vector<8x32xf32>
    %121 = vector.extract_strided_slice %114 {offsets = [0, 0], sizes = [8, 8], strides = [1, 1]} : vector<8x32xf32> to vector<8x8xf32>
    %122 = vector.extract_strided_slice %114 {offsets = [0, 8], sizes = [8, 8], strides = [1, 1]} : vector<8x32xf32> to vector<8x8xf32>
    %123 = vector.extract_strided_slice %114 {offsets = [0, 16], sizes = [8, 8], strides = [1, 1]} : vector<8x32xf32> to vector<8x8xf32>
    %124 = vector.extract_strided_slice %114 {offsets = [0, 24], sizes = [8, 8], strides = [1, 1]} : vector<8x32xf32> to vector<8x8xf32>
    %125 = vector.shape_cast %121 : vector<8x8xf32> to vector<1x8x8xf32>
    %126 = vector.shape_cast %122 : vector<8x8xf32> to vector<1x8x8xf32>
    %127 = vector.shape_cast %123 : vector<8x8xf32> to vector<1x8x8xf32>
    %128 = vector.shape_cast %124 : vector<8x8xf32> to vector<1x8x8xf32>
    %129 = tpu.concatenate %125, %126, %127, %128 in 0 : vector<1x8x8xf32>, vector<1x8x8xf32>, vector<1x8x8xf32>, vector<1x8x8xf32> -> vector<4x8x8xf32>
    %130 = vector.extract_strided_slice %119 {offsets = [0, 0], sizes = [8, 8], strides = [1, 1]} : vector<8x32xf32> to vector<8x8xf32>
    %131 = vector.extract_strided_slice %119 {offsets = [0, 8], sizes = [8, 8], strides = [1, 1]} : vector<8x32xf32> to vector<8x8xf32>
    %132 = vector.extract_strided_slice %119 {offsets = [0, 16], sizes = [8, 8], strides = [1, 1]} : vector<8x32xf32> to vector<8x8xf32>
    %133 = vector.extract_strided_slice %119 {offsets = [0, 24], sizes = [8, 8], strides = [1, 1]} : vector<8x32xf32> to vector<8x8xf32>
    %134 = vector.shape_cast %130 : vector<8x8xf32> to vector<1x8x8xf32>
    %135 = vector.shape_cast %131 : vector<8x8xf32> to vector<1x8x8xf32>
    %136 = vector.shape_cast %132 : vector<8x8xf32> to vector<1x8x8xf32>
    %137 = vector.shape_cast %133 : vector<8x8xf32> to vector<1x8x8xf32>
    %138 = tpu.concatenate %134, %135, %136, %137 in 0 : vector<1x8x8xf32>, vector<1x8x8xf32>, vector<1x8x8xf32>, vector<1x8x8xf32> -> vector<4x8x8xf32>
    %139 = vector.extract_strided_slice %120 {offsets = [0, 0], sizes = [8, 8], strides = [1, 1]} : vector<8x32xf32> to vector<8x8xf32>
    %140 = vector.extract_strided_slice %120 {offsets = [0, 8], sizes = [8, 8], strides = [1, 1]} : vector<8x32xf32> to vector<8x8xf32>
    %141 = vector.extract_strided_slice %120 {offsets = [0, 16], sizes = [8, 8], strides = [1, 1]} : vector<8x32xf32> to vector<8x8xf32>
    %142 = vector.extract_strided_slice %120 {offsets = [0, 24], sizes = [8, 8], strides = [1, 1]} : vector<8x32xf32> to vector<8x8xf32>
    %143 = vector.shape_cast %139 : vector<8x8xf32> to vector<1x8x8xf32>
    %144 = vector.shape_cast %140 : vector<8x8xf32> to vector<1x8x8xf32>
    %145 = vector.shape_cast %141 : vector<8x8xf32> to vector<1x8x8xf32>
    %146 = vector.shape_cast %142 : vector<8x8xf32> to vector<1x8x8xf32>
    %147 = tpu.concatenate %143, %144, %145, %146 in 0 : vector<1x8x8xf32>, vector<1x8x8xf32>, vector<1x8x8xf32>, vector<1x8x8xf32> -> vector<4x8x8xf32>
    %148 = arith.truncf %129 : vector<4x8x8xf32> to vector<4x8x8xbf16>
    %149 = arith.truncf %138 : vector<4x8x8xf32> to vector<4x8x8xbf16>
    "tpu.trace_start"() <{level = 10 : i32, message = "hqd,hkd->hqk"}> : () -> ()
    %cst_48 = arith.constant dense<0.000000e+00> : vector<4x8x8xf32>
    %150 = tpu.matmul %148, %149, %cst_48 {dimension_numbers = #tpu.dot_dimension_numbers<[2], [2], [1], [1], [0, 0, 0, 1, 1, 1], [0], [0]>} : vector<4x8x8xbf16>, vector<4x8x8xbf16>, vector<4x8x8xf32> -> vector<4x8x8xf32>
    "tpu.trace_stop"() : () -> ()
    %cst_49 = arith.constant 0.353553385 : f32
    %151 = vector.broadcast %cst_49 : f32 to vector<4x8x8xf32>
    %152 = arith.mulf %150, %151 : vector<4x8x8xf32>
    %153 = vector.shape_cast %5 : vector<1x8xf32> to vector<1x8xf32>
    %154 = vector.broadcast %153 : vector<1x8xf32> to vector<8x8xf32>
    %155 = vector.shape_cast %154 : vector<8x8xf32> to vector<1x8x8xf32>
    %156 = vector.broadcast %155 : vector<1x8x8xf32> to vector<4x8x8xf32>
    %157 = arith.addf %152, %156 : vector<4x8x8xf32>
    %cst_50 = arith.constant dense<0xFF800000> : vector<4x8xf32>
    %158 = vector.multi_reduction <maximumf>, %157, %cst_50 [2] : vector<4x8x8xf32> to vector<4x8xf32>
    %159 = vector.shape_cast %158 : vector<4x8xf32> to vector<4x8x1xf32>
    %160 = vector.broadcast %159 : vector<4x8x1xf32> to vector<4x8x8xf32>
    %161 = arith.subf %157, %160 : vector<4x8x8xf32>
    %162 = math.exp %161 : vector<4x8x8xf32>
    %cst_51 = arith.constant dense<0.000000e+00> : vector<4x8xf32>
    %163 = vector.multi_reduction <add>, %162, %cst_51 [2] : vector<4x8x8xf32> to vector<4x8xf32>
    %164 = vector.shape_cast %163 : vector<4x8xf32> to vector<4x8x1xf32>
    %165 = tpu.reciprocal %164 {approx = true} : vector<4x8x1xf32> -> vector<4x8x1xf32>
    %166 = vector.broadcast %165 : vector<4x8x1xf32> to vector<4x8x8xf32>
    %167 = arith.mulf %162, %166 : vector<4x8x8xf32>
    %168 = arith.truncf %167 : vector<4x8x8xf32> to vector<4x8x8xbf16>
    %169 = arith.truncf %147 : vector<4x8x8xf32> to vector<4x8x8xbf16>
    "tpu.trace_start"() <{level = 10 : i32, message = "hqk,hkd->hqd"}> : () -> ()
    %cst_52 = arith.constant dense<0.000000e+00> : vector<4x8x8xf32>
    %170 = tpu.matmul %168, %169, %cst_52 {dimension_numbers = #tpu.dot_dimension_numbers<[2], [1], [1], [2], [0, 0, 0, 1, 1, 2], [0], [0]>} : vector<4x8x8xbf16>, vector<4x8x8xbf16>, vector<4x8x8xf32> -> vector<4x8x8xf32>
    "tpu.trace_stop"() : () -> ()
    %171 = vector.extract_strided_slice %170 {offsets = [0, 0, 0], sizes = [1, 8, 8], strides = [1, 1, 1]} : vector<4x8x8xf32> to vector<1x8x8xf32>
    %172 = vector.shape_cast %171 : vector<1x8x8xf32> to vector<8x8xf32>
    %173 = vector.extract_strided_slice %170 {offsets = [1, 0, 0], sizes = [1, 8, 8], strides = [1, 1, 1]} : vector<4x8x8xf32> to vector<1x8x8xf32>
    %174 = vector.shape_cast %173 : vector<1x8x8xf32> to vector<8x8xf32>
    %175 = vector.extract_strided_slice %170 {offsets = [2, 0, 0], sizes = [1, 8, 8], strides = [1, 1, 1]} : vector<4x8x8xf32> to vector<1x8x8xf32>
    %176 = vector.shape_cast %175 : vector<1x8x8xf32> to vector<8x8xf32>
    %177 = vector.extract_strided_slice %170 {offsets = [3, 0, 0], sizes = [1, 8, 8], strides = [1, 1, 1]} : vector<4x8x8xf32> to vector<1x8x8xf32>
    %178 = vector.shape_cast %177 : vector<1x8x8xf32> to vector<8x8xf32>
    %179 = tpu.concatenate %172, %174, %176, %178 in 1 : vector<8x8xf32>, vector<8x8xf32>, vector<8x8xf32>, vector<8x8xf32> -> vector<8x32xf32>
    %180 = arith.truncf %179 : vector<8x32xf32> to vector<8x32xbf16>
    %cst_53 = arith.constant dense<0.000000e+00> : vector<8x32xf32>
    %181 = tpu.matmul %180, %109, %cst_53 {dimension_numbers = #tpu.dot_dimension_numbers<[1], [0], [0], [1], [0, 0, 1, 1], [], []>} : vector<8x32xbf16>, vector<32x32xbf16>, vector<8x32xf32> -> vector<8x32xf32>
    %182 = vector.broadcast %110 : vector<1x32xf32> to vector<8x32xf32>
    %183 = arith.addf %181, %182 : vector<8x32xf32>
    %184 = arith.addf %104, %183 : vector<8x32xf32>
    %c0_54 = arith.constant 0 : index
    %c0_55 = arith.constant 0 : index
    %185 = vector.load %arg17[%c0_54, %c0_55] : memref<1x32xf32, #tpu.memory_space<vmem>>, vector<1x32xf32>
    %c0_56 = arith.constant 0 : index
    %c0_57 = arith.constant 0 : index
    %186 = vector.load %arg18[%c0_56, %c0_57] : memref<1x32xf32, #tpu.memory_space<vmem>>, vector<1x32xf32>
    %cst_58 = arith.constant dense<0.000000e+00> : vector<8xf32>
    %187 = vector.multi_reduction <add>, %184, %cst_58 [1] : vector<8x32xf32> to vector<8xf32>
    %188 = vector.shape_cast %187 : vector<8xf32> to vector<8x1xf32>
    %cst_59 = arith.constant 3.200000e+01 : f32
    %189 = vector.broadcast %cst_59 : f32 to vector<8x1xf32>
    %190 = arith.divf %188, %189 : vector<8x1xf32>
    %191 = vector.broadcast %190 : vector<8x1xf32> to vector<8x32xf32>
    %192 = arith.subf %184, %191 : vector<8x32xf32>
    %193 = arith.mulf %192, %192 : vector<8x32xf32>
    %cst_60 = arith.constant dense<0.000000e+00> : vector<8xf32>
    %194 = vector.multi_reduction <add>, %193, %cst_60 [1] : vector<8x32xf32> to vector<8xf32>
    %195 = vector.shape_cast %194 : vector<8xf32> to vector<8x1xf32>
    %cst_61 = arith.constant 3.200000e+01 : f32
    %196 = vector.broadcast %cst_61 : f32 to vector<8x1xf32>
    %197 = arith.divf %195, %196 : vector<8x1xf32>
    %198 = vector.broadcast %190 : vector<8x1xf32> to vector<8x32xf32>
    %199 = arith.subf %184, %198 : vector<8x32xf32>
    %cst_62 = arith.constant 9.99999974E-6 : f32
    %200 = vector.broadcast %cst_62 : f32 to vector<8x1xf32>
    %201 = arith.addf %197, %200 : vector<8x1xf32>
    %202 = math.rsqrt %201 : vector<8x1xf32>
    %203 = vector.broadcast %202 : vector<8x1xf32> to vector<8x32xf32>
    %204 = arith.mulf %199, %203 : vector<8x32xf32>
    %205 = vector.broadcast %185 : vector<1x32xf32> to vector<8x32xf32>
    %206 = arith.mulf %204, %205 : vector<8x32xf32>
    %207 = vector.broadcast %186 : vector<1x32xf32> to vector<8x32xf32>
    %208 = arith.addf %206, %207 : vector<8x32xf32>
    %c0_63 = arith.constant 0 : index
    %c0_64 = arith.constant 0 : index
    %209 = vector.load %arg19[%c0_63, %c0_64] : memref<32x64xbf16, #tpu.memory_space<vmem>>, vector<32x64xbf16>
    %c0_65 = arith.constant 0 : index
    %c0_66 = arith.constant 0 : index
    %210 = vector.load %arg20[%c0_65, %c0_66] : memref<1x64xf32, #tpu.memory_space<vmem>>, vector<1x64xf32>
    %c0_67 = arith.constant 0 : index
    %c0_68 = arith.constant 0 : index
    %211 = vector.load %arg21[%c0_67, %c0_68] : memref<64x32xbf16, #tpu.memory_space<vmem>>, vector<64x32xbf16>
    %c0_69 = arith.constant 0 : index
    %c0_70 = arith.constant 0 : index
    %212 = vector.load %arg22[%c0_69, %c0_70] : memref<1x32xf32, #tpu.memory_space<vmem>>, vector<1x32xf32>
    %213 = arith.truncf %208 : vector<8x32xf32> to vector<8x32xbf16>
    %cst_71 = arith.constant dense<0.000000e+00> : vector<8x64xf32>
    %214 = tpu.matmul %213, %209, %cst_71 {dimension_numbers = #tpu.dot_dimension_numbers<[1], [0], [0], [1], [0, 0, 1, 1], [], []>} : vector<8x32xbf16>, vector<32x64xbf16>, vector<8x64xf32> -> vector<8x64xf32>
    %215 = vector.broadcast %210 : vector<1x64xf32> to vector<8x64xf32>
    %216 = arith.addf %214, %215 : vector<8x64xf32>
    %cst_72 = arith.constant 0.000000e+00 : f32
    %217 = vector.broadcast %cst_72 : f32 to vector<8x64xf32>
    %218 = arith.maximumf %216, %217 : vector<8x64xf32>
    %219 = arith.truncf %218 : vector<8x64xf32> to vector<8x64xbf16>
    %cst_73 = arith.constant dense<0.000000e+00> : vector<8x32xf32>
    %220 = tpu.matmul %219, %211, %cst_73 {dimension_numbers = #tpu.dot_dimension_numbers<[1], [0], [0], [1], [0, 0, 1, 1], [], []>} : vector<8x64xbf16>, vector<64x32xbf16>, vector<8x32xf32> -> vector<8x32xf32>
    %221 = vector.broadcast %212 : vector<1x32xf32> to vector<8x32xf32>
    %222 = arith.addf %220, %221 : vector<8x32xf32>
    %223 = arith.addf %208, %222 : vector<8x32xf32>
    %c0_74 = arith.constant 0 : index
    %c0_75 = arith.constant 0 : index
    %224 = vector.load %arg23[%c0_74, %c0_75] : memref<1x32xf32, #tpu.memory_space<vmem>>, vector<1x32xf32>
    %c0_76 = arith.constant 0 : index
    %c0_77 = arith.constant 0 : index
    %225 = vector.load %arg24[%c0_76, %c0_77] : memref<1x32xf32, #tpu.memory_space<vmem>>, vector<1x32xf32>
    %cst_78 = arith.constant dense<0.000000e+00> : vector<8xf32>
    %226 = vector.multi_reduction <add>, %223, %cst_78 [1] : vector<8x32xf32> to vector<8xf32>
    %227 = vector.shape_cast %226 : vector<8xf32> to vector<8x1xf32>
    %cst_79 = arith.constant 3.200000e+01 : f32
    %228 = vector.broadcast %cst_79 : f32 to vector<8x1xf32>
    %229 = arith.divf %227, %228 : vector<8x1xf32>
    %230 = vector.broadcast %229 : vector<8x1xf32> to vector<8x32xf32>
    %231 = arith.subf %223, %230 : vector<8x32xf32>
    %232 = arith.mulf %231, %231 : vector<8x32xf32>
    %cst_80 = arith.constant dense<0.000000e+00> : vector<8xf32>
    %233 = vector.multi_reduction <add>, %232, %cst_80 [1] : vector<8x32xf32> to vector<8xf32>
    %234 = vector.shape_cast %233 : vector<8xf32> to vector<8x1xf32>
    %cst_81 = arith.constant 3.200000e+01 : f32
    %235 = vector.broadcast %cst_81 : f32 to vector<8x1xf32>
    %236 = arith.divf %234, %235 : vector<8x1xf32>
    %237 = vector.broadcast %229 : vector<8x1xf32> to vector<8x32xf32>
    %238 = arith.subf %223, %237 : vector<8x32xf32>
    %cst_82 = arith.constant 9.99999974E-6 : f32
    %239 = vector.broadcast %cst_82 : f32 to vector<8x1xf32>
    %240 = arith.addf %236, %239 : vector<8x1xf32>
    %241 = math.rsqrt %240 : vector<8x1xf32>
    %242 = vector.broadcast %241 : vector<8x1xf32> to vector<8x32xf32>
    %243 = arith.mulf %238, %242 : vector<8x32xf32>
    %244 = vector.broadcast %224 : vector<1x32xf32> to vector<8x32xf32>
    %245 = arith.mulf %243, %244 : vector<8x32xf32>
    %246 = vector.broadcast %225 : vector<1x32xf32> to vector<8x32xf32>
    %247 = arith.addf %245, %246 : vector<8x32xf32>
    %248 = arith.truncf %247 : vector<8x32xf32> to vector<8x32xbf16>
    %c0_83 = arith.constant 0 : index
    %c0_84 = arith.constant 0 : index
    %249 = vector.load %arg25[%c0_83, %c0_84] : memref<32x16xbf16, #tpu.memory_space<vmem>>, vector<32x16xbf16>
    %cst_85 = arith.constant dense<0.000000e+00> : vector<8x16xf32>
    %250 = tpu.matmul %248, %249, %cst_85 {dimension_numbers = #tpu.dot_dimension_numbers<[1], [0], [0], [1], [0, 0, 1, 1], [], []>} : vector<8x32xbf16>, vector<32x16xbf16>, vector<8x16xf32> -> vector<8x16xf32>
    %c0_86 = arith.constant 0 : index
    %c0_87 = arith.constant 0 : index
    %251 = vector.load %arg26[%c0_86, %c0_87] : memref<1x16xf32, #tpu.memory_space<vmem>>, vector<1x16xf32>
    %252 = vector.broadcast %251 : vector<1x16xf32> to vector<8x16xf32>
    %253 = arith.addf %250, %252 : vector<8x16xf32>
    %c0_88 = arith.constant 0 : index
    %c0_89 = arith.constant 0 : index
    %c0_90 = arith.constant 0 : index
    %254 = vector.load %arg27[%c0_88, %c0_89, %c0_90] : memref<1x8x16xf32, #tpu.memory_space<vmem>>, vector<1x8x16xf32>
    %255 = vector.shape_cast %254 : vector<1x8x16xf32> to vector<8x16xf32>
    %256 = vector.shape_cast %253 : vector<8x16xf32> to vector<1x8x16xf32>
    tpu.vector_store %arg27[%c0_88, %c0_89, %c0_90], %256 {strides = array<i32>} : memref<1x8x16xf32, #tpu.memory_space<vmem>>, vector<1x8x16xf32>,
    return
  }
  func.func @transform_0(%arg0: i32) -> (i32, i32, i32) {
    %c0_i32 = arith.constant 0 : i32
    %c0_i32_0 = arith.constant 0 : i32
    %c0_i32_1 = arith.constant 0 : i32
    return %arg0, %c0_i32, %c0_i32_0 : i32, i32, i32
  }
  func.func @transform_1(%arg0: i32) -> (i32, i32, i32) {
    %c0_i32 = arith.constant 0 : i32
    %c0_i32_0 = arith.constant 0 : i32
    %c0_i32_1 = arith.constant 0 : i32
    return %arg0, %c0_i32, %c0_i32_0 : i32, i32, i32
  }
  func.func @transform_2(%arg0: i32) -> (i32, i32, i32) {
    %c0_i32 = arith.constant 0 : i32
    %c0_i32_0 = arith.constant 0 : i32
    %c0_i32_1 = arith.constant 0 : i32
    return %arg0, %c0_i32, %c0_i32_0 : i32, i32, i32
  }
  func.func @transform_3(%arg0: i32) -> (i32, i32, i32) {
    %c0_i32 = arith.constant 0 : i32
    %c0_i32_0 = arith.constant 0 : i32
    %c0_i32_1 = arith.constant 0 : i32
    return %arg0, %c0_i32, %c0_i32_0 : i32, i32, i32
  }
  func.func @transform_4(%arg0: i32) -> (i32, i32) {
    %c0_i32 = arith.constant 0 : i32
    %c0_i32_0 = arith.constant 0 : i32
    %c0_i32_1 = arith.constant 0 : i32
    return %c0_i32, %c0_i32_0 : i32, i32
  }
  func.func @transform_5(%arg0: i32) -> (i32, i32) {
    %c0_i32 = arith.constant 0 : i32
    %c0_i32_0 = arith.constant 0 : i32
    %c0_i32_1 = arith.constant 0 : i32
    return %c0_i32, %c0_i32_0 : i32, i32
  }
  func.func @transform_6(%arg0: i32) -> (i32, i32) {
    %c0_i32 = arith.constant 0 : i32
    %c0_i32_0 = arith.constant 0 : i32
    %c0_i32_1 = arith.constant 0 : i32
    return %c0_i32, %c0_i32_0 : i32, i32
  }
  func.func @transform_7(%arg0: i32) -> (i32, i32) {
    %c0_i32 = arith.constant 0 : i32
    %c0_i32_0 = arith.constant 0 : i32
    %c0_i32_1 = arith.constant 0 : i32
    return %c0_i32, %c0_i32_0 : i32, i32
  }
  func.func @transform_8(%arg0: i32) -> (i32, i32) {
    %c0_i32 = arith.constant 0 : i32
    %c0_i32_0 = arith.constant 0 : i32
    %c0_i32_1 = arith.constant 0 : i32
    return %c0_i32, %c0_i32_0 : i32, i32
  }
  func.func @transform_9(%arg0: i32) -> (i32, i32) {
    %c0_i32 = arith.constant 0 : i32
    %c0_i32_0 = arith.constant 0 : i32
    %c0_i32_1 = arith.constant 0 : i32
    return %c0_i32, %c0_i32_0 : i32, i32
  }
  func.func @transform_10(%arg0: i32) -> (i32, i32) {
    %c0_i32 = arith.constant 0 : i32
    %c0_i32_0 = arith.constant 0 : i32
    %c0_i32_1 = arith.constant 0 : i32
    return %c0_i32, %c0_i32_0 : i32, i32
  }
  func.func @transform_11(%arg0: i32) -> (i32, i32) {
    %c0_i32 = arith.constant 0 : i32
    %c0_i32_0 = arith.constant 0 : i32
    %c0_i32_1 = arith.constant 0 : i32
    return %c0_i32, %c0_i32_0 : i32, i32
  }
  func.func @transform_12(%arg0: i32) -> (i32, i32) {
    %c0_i32 = arith.constant 0 : i32
    %c0_i32_0 = arith.constant 0 : i32
    %c0_i32_1 = arith.constant 0 : i32
    return %c0_i32, %c0_i32_0 : i32, i32
  }
  func.func @transform_13(%arg0: i32) -> (i32, i32) {
    %c0_i32 = arith.constant 0 : i32
    %c0_i32_0 = arith.constant 0 : i32
    %c0_i32_1 = arith.constant 0 : i32
    return %c0_i32, %c0_i32_0 : i32, i32
  }
  func.func @transform_14(%arg0: i32) -> (i32, i32) {
    %c0_i32 = arith.constant 0 : i32
    %c0_i32_0 = arith.constant 0 : i32
    %c0_i32_1 = arith.constant 0 : i32
    return %c0_i32, %c0_i32_0 : i32, i32
  }
  func.func @transform_15(%arg0: i32) -> (i32, i32) {
    %c0_i32 = arith.constant 0 : i32
    %c0_i32_0 = arith.constant 0 : i32
    %c0_i32_1 = arith.constant 0 : i32
    return %c0_i32, %c0_i32_0 : i32, i32
  }
  func.func @transform_16(%arg0: i32) -> (i32, i32) {
    %c0_i32 = arith.constant 0 : i32
    %c0_i32_0 = arith.constant 0 : i32
    %c0_i32_1 = arith.constant 0 : i32
    return %c0_i32, %c0_i32_0 : i32, i32
  }
  func.func @transform_17(%arg0: i32) -> (i32, i32) {
    %c0_i32 = arith.constant 0 : i32
    %c0_i32_0 = arith.constant 0 : i32
    %c0_i32_1 = arith.constant 0 : i32
    return %c0_i32, %c0_i32_0 : i32, i32
  }
  func.func @transform_18(%arg0: i32) -> (i32, i32) {
    %c0_i32 = arith.constant 0 : i32
    %c0_i32_0 = arith.constant 0 : i32
    %c0_i32_1 = arith.constant 0 : i32
    return %c0_i32, %c0_i32_0 : i32, i32
  }
  func.func @transform_19(%arg0: i32) -> (i32, i32) {
    %c0_i32 = arith.constant 0 : i32
    %c0_i32_0 = arith.constant 0 : i32
    %c0_i32_1 = arith.constant 0 : i32
    return %c0_i32, %c0_i32_0 : i32, i32
  }
  func.func @transform_20(%arg0: i32) -> (i32, i32) {
    %c0_i32 = arith.constant 0 : i32
    %c0_i32_0 = arith.constant 0 : i32
    %c0_i32_1 = arith.constant 0 : i32
    return %c0_i32, %c0_i32_0 : i32, i32
  }
  func.func @transform_21(%arg0: i32) -> (i32, i32) {
    %c0_i32 = arith.constant 0 : i32
    %c0_i32_0 = arith.constant 0 : i32
    %c0_i32_1 = arith.constant 0 : i32
    return %c0_i32, %c0_i32_0 : i32, i32
  }
  func.func @transform_22(%arg0: i32) -> (i32, i32) {
    %c0_i32 = arith.constant 0 : i32
    %c0_i32_0 = arith.constant 0 : i32
    %c0_i32_1 = arith.constant 0 : i32
    return %c0_i32, %c0_i32_0 : i32, i32
  }
  func.func @transform_23(%arg0: i32) -> (i32, i32) {
    %c0_i32 = arith.constant 0 : i32
    %c0_i32_0 = arith.constant 0 : i32
    %c0_i32_1 = arith.constant 0 : i32
    return %c0_i32, %c0_i32_0 : i32, i32
  }
  func.func @transform_24(%arg0: i32) -> (i32, i32) {
    %c0_i32 = arith.constant 0 : i32
    %c0_i32_0 = arith.constant 0 : i32
    %c0_i32_1 = arith.constant 0 : i32
    return %c0_i32, %c0_i32_0 : i32, i32
  }
  func.func @transform_25(%arg0: i32) -> (i32, i32) {
    %c0_i32 = arith.constant 0 : i32
    %c0_i32_0 = arith.constant 0 : i32
    %c0_i32_1 = arith.constant 0 : i32
    return %c0_i32, %c0_i32_0 : i32, i32
  }
  func.func @transform_26(%arg0: i32) -> (i32, i32, i32) {
    %c0_i32 = arith.constant 0 : i32
    %c0_i32_0 = arith.constant 0 : i32
    %c0_i32_1 = arith.constant 0 : i32
    return %arg0, %c0_i32, %c0_i32_0 : i32, i32, i32
  }
}

</mosaic_0001>

<bundles_post_ra>
// kernel: transformer_forward.2
= control target key start
LH: loop header
LB: loop body
LE: loop exit
PB: predicated region body
PF: predicated region fallthrough
CT: control target
= control target key end

     0   :  { %s1266_s29 = smov 0   ;;  %s1403_s0 = inlined_call_operand.vmem [shape: f32[2,8,32], index: 0, kind: input, shape index: {}]   ;;  %s1404_s1 = inlined_call_operand.vmem [shape: f32[2,1,8], index: 1, kind: input, shape index: {}]   ;;  %s1405_s2 = inlined_call_operand.vmem [shape: bf16[32,96], index: 2, kind: input, shape index: {}]   ;;  %s1406_s3 = inlined_call_operand.vmem [shape: f32[1,96], index: 3, kind: input, shape index: {}]   ;;  %s1407_s4 = inlined_call_operand.vmem [shape: bf16[32,32], index: 4, kind: input, shape index: {}]   ;;  %s1408_s5 = inlined_call_operand.vmem [shape: f32[1,32], index: 5, kind: input, shape index: {}]   ;;  %s1409_s6 = inlined_call_operand.vmem [shape: f32[1,32], index: 6, kind: input, shape index: {}]   ;;  %s1410_s7 = inlined_call_operand.vmem [shape: f32[1,32], index: 7, kind: input, shape index: {}]   ;;  %s1411_s8 = inlined_call_operand.vmem [shape: bf16[32,64], index: 8, kind: input, shape index: {}]   ;;  %s1412_s9 = inlined_call_operand.vmem [shape: f32[1,64], index: 9, kind: input, shape index: {}]   ;;  %s1413_s10 = inlined_call_operand.vmem [shape: bf16[64,32], index: 10, kind: input, shape index: {}]   ;;  %s1414_s11 = inlined_call_operand.vmem [shape: f32[1,32], index: 11, kind: input, shape index: {}]   ;;  %s1415_s12 = inlined_call_operand.vmem [shape: f32[1,32], index: 12, kind: input, shape index: {}]   ;;  %s1416_s13 = inlined_call_operand.vmem [shape: f32[1,32], index: 13, kind: input, shape index: {}]   ;;  %s1417_s14 = inlined_call_operand.vmem [shape: f32[2,8,32], index: 14, kind: output, shape index: {}]  }
   0x1 LB: > { %s1055_s30 = sadd.s32 4294967295, %s1180_s29   ;;  %p1059_p0 = scmp.ge.s32.totalorder %s1180_s29, 1  ;;  %s1180_s29 = sphi %s1266_s29, %s24_s29  }
   0x2   : > { %p419_p1 = scmp.lt.s32.totalorder %s1180_s29, 3 }
   0x4   : > { %p420_p2 = pnand %p1059_p0, %p419_p1 }
   0x5   : > { %p466_p3 = scmp.lt.s32.totalorder (!%p420_p2), %s1055_s30, 1  ;;  %s1182_s28 = smov (!%p420_p2), 104  }
   0x6   : > { %423 = sbr.rel (%p420_p2) target bundleno = 1977 (0x7b9), region = 76  ;;  %s1183_s15 = smov (!%p420_p2), 120  }
   0x7   : > { %s1184_s16 = smov (!%p420_p2), 112   ;;  %s1185_s17 = smov (!%p420_p2), 96  }
   0x8   : > { %s1186_s21 = smov (!%p420_p2), 64   ;;  %s1188_s23 = smov (!%p420_p2), 8  }
   0x9   : > { %s1189_s24 = smov (!%p420_p2), 24  }
   0xb   : > { %v1117_v0 = vld [vmem:[%s1405_s2 + $0x8] sm:$0xff]  ;;  %v1116_v1 = vld [vmem:[%s1405_s2] sm:$0xff]  ;;  %s1419_s30 = smov (!%p466_p3, %s1055_s30), 1  ;;  %vm506_vm0 = vcmask 261120   ;;  %vm542_vm1 = vcmask 64512   ;;  %vm698_vm2 = vcmask 1043456  }
   0xc   : > { %516 = vmatpush.bf16.msra.mxu0 %v1117_v0  ;;  %s1060_s19 = sshll.u32 %s1419_s30, 3  ;;  %s472_s22 = scalar_lea.vmem %s1404_s1, %s1419_s30  ;;  %v1143_v4 = vld [vmem:[%s1406_s3] ss:$0 sm:$0xff]  ;;  %vm791_vm3 = vcmask 130048   ;;  %vm793_vm4 = vcmask 195584   ;;  %vm942_vm9 = vcmask 523264  }
   0xd   : > { %s469_s25 = scalar_lea.vmem %s1403_s0, %s1060_s19  ;;  %v1144_v35 = vld [vmem:[%s472_s22] ss:$0 sm:$0xff]  ;;  %s1187_s22 = smov 16  }
   0xe   : > { %v1292_v2 = vld [vmem:[%s469_s25] sm:$0xff] }
   0xf   : > { %v490_v3 = vpack.c.bf16 %v1292_v2, %v1292_v2 }
  0x10   : > { %517 = vmatpush.bf16.msra.mxu0 %v1116_v1 }
  0x13   : > { %1070 = vmatmul.msk.bf16.vlgmr.msra.gmra.mxu0 %vm506_vm0, %v490_v3 }
  0x90   : > { %v519_v5 = vpop.f32.mrf.mxu0 }
  0x91   : > { %v520_v6 = vadd.f32 %v1143_v4, %v519_v5 }
  0x93   : > { %530 = vrot.lane.b32.xlu1 %v520_v6, %s1182_s28  ;;  %524 = vrot.lane.b32.xlu0 %v520_v6, %s1183_s15  ;;  %v533_v8 = vpack.c.bf16 %v520_v6, %v520_v6 }
  0x95   : > { %v538_v9 = vunpack.c.l.b16 %v533_v8 }
  0x97   : > { %v1300_v10 = vpack.c.b16 %v538_v9, %v538_v9 }
  0x98   : > { %v521_v7 = vpop.f32.mrf.mxu0 }
  0x9b   : > { %527 = vrot.lane.b32.xlu0 %v520_v6, %s1184_s16 }
  0xa3   : > { %540 = vrot.lane.b32.xlu0 %v1300_v10, %s1185_s17 }
 0x105   : > { %v525_v11 = vpop.permute.xlu0 %524  ;;  %v531_v17 = vpop.permute.xlu1 %530 }
 0x106   : > { %v534_v12 = vpack.c.bf16 %v525_v11, %v525_v11  ;;  %v536_v19 = vpack.c.bf16 %v531_v17, %v531_v17 }
 0x108   : > { %v563_v13 = vunpack.c.l.b16 %v534_v12  ;;  %v611_v22 = vunpack.c.l.b16 %v536_v19 }
 0x10a   : > { %v1303_v14 = vpack.c.b16 %v563_v13, %v563_v13  ;;  %v612_v24 = vpack.c.b16 %v611_v22, %v611_v22 }
 0x10c   : > { %565 = vrot.lane.b32.xlu1 %v1303_v14, %s1185_s17 }
 0x10d   : > { %v528_v15 = vpop.permute.xlu0 %527 }
 0x10e   : > { %v535_v16 = vpack.c.bf16 %v528_v15, %v528_v15 }
 0x110   : > { %v587_v18 = vunpack.c.l.b16 %v535_v16 }
 0x112   : > { %v1306_v20 = vpack.c.b16 %v587_v18, %v587_v18 }
 0x114   : > { %589 = vrot.lane.b32.xlu2 %v1306_v20, %s1185_s17 }
 0x115   : > { %v541_v21 = vpop.permute.xlu0 %540 }
 0x116   : > { %v547_v23 = vsel %vm542_vm1, %v541_v21, 0 }
 0x117   : > { %556 = vmatpush.bf16.xpose.msra.mxu1 %v547_v23 }
 0x11c   : > { %613 = vrot.lane.b32.xlu2 %v612_v24, %s1185_s17  ;;  %s476_s17 = scalar_lea.vmem %s1417_s14, %s1060_s19 }
 0x11e   : > { %1071 = vmatmul.msk.bf16.vlgmr.msra.gmra.mxu1 %vm542_vm1, %v533_v8 }
 0x16e   : > { %v590_v25 = vpop.permute.xlu2 %589 }
 0x16f   : > { %v595_v26 = vsel %vm542_vm1, %v590_v25, 0 }
 0x170   : > { %604 = vmatpush.bf16.xpose.msra.mxu3 %v595_v26 }
 0x176   : > { %v614_v27 = vpop.permute.xlu2 %613 }
 0x177   : > { %1073 = vmatmul.msk.bf16.vlgmr.msra.gmra.mxu3 %vm542_vm1, %v535_v16  ;;  %v619_v28 = vsel %vm542_vm1, %v614_v27, 0 }
 0x178   : > { %628 = vmatpush.bf16.xpose.msrb.mxu0 %v619_v28 }
 0x17e   : > { %v566_v29 = vpop.permute.xlu1 %565 }
 0x17f   : > { %1074 = vmatmul.msk.bf16.vlgmr.msrb.gmra.mxu0 %vm542_vm1, %v536_v19  ;;  %v571_v30 = vsel %vm542_vm1, %v566_v29, 0 }
 0x180   : > { %580 = vmatpush.bf16.xpose.msra.mxu2 %v571_v30 }
 0x187   : > { %1072 = vmatmul.msk.bf16.vlgmr.msra.gmra.mxu2 %vm542_vm1, %v534_v12 }
 0x19b   : > { %v558_v31 = vpop.f32.mrf.mxu1 }
 0x19c   : > { %v634_v39 = vmul.f32 0.35355338, %v558_v31 }
 0x19e   : > { %v641_v44 = vadd.f32 %v1144_v35, %v634_v39 }
 0x1a0   : > { %v645_v46 = vsel %vm542_vm1, %v641_v44, -inf }
 0x1a3   : > { %v560_v32 = vpop.f32.mrf.mxu1 }
 0x1fa   : > { %v606_v33 = vpop.f32.mrf.mxu3 }
 0x1fb   : > { %v636_v34 = vmul.f32 0.35355338, %v606_v33 }
 0x1fc   : > { %v630_v36 = vpop.f32.mrf.mxu0 }
 0x1fd   : > { %v637_v37 = vmul.f32 0.35355338, %v630_v36  ;;  %v643_v38 = vadd.f32 %v1144_v35, %v636_v34 }
 0x1ff   : > { %v651_v40 = vsel %vm542_vm1, %v643_v38, -inf  ;;  %v644_v41 = vadd.f32 %v1144_v35, %v637_v37 }
 0x200   : > { %652 = vmax.xlane.f32.xlu2 %v651_v40 }
 0x201   : > { %v654_v42 = vsel %vm542_vm1, %v644_v41, -inf }
 0x202   : > { %v608_v43 = vpop.f32.mrf.mxu3  ;;  %655 = vmax.xlane.f32.xlu0 %v654_v42  ;;  %v1118_v42 = vld [vmem:[%s1407_s4] sm:$0xff] }
 0x204   : > { %v632_v45 = vpop.f32.mrf.mxu0 }
 0x208   : > { %646 = vmax.xlane.f32.xlu2 %v645_v46 }
 0x20a   : > { %v582_v47 = vpop.f32.mrf.mxu2 }
 0x20b   : > { %v635_v48 = vmul.f32 0.35355338, %v582_v47 }
 0x20d   : > { %v642_v49 = vadd.f32 %v1144_v35, %v635_v48 }
 0x20f   : > { %v648_v50 = vsel %vm542_vm1, %v642_v49, -inf }
 0x210   : > { %649 = vmax.xlane.f32.xlu1 %v648_v50  ;;  %v1145_v50 = vld [vmem:[%s1408_s5] ss:$0 sm:$0xff] }
 0x212   : > { %v584_v51 = vpop.f32.mrf.mxu2 }
 0x273   : > { %v653_v52 = vpop.xlane.xlu2 %652 }
 0x274   : > { %v659_v53 = vsub.f32 %v643_v38, %v653_v52 }
 0x275   : > { %v656_v54 = vpop.xlane.xlu0 %655 }
 0x276   : > { %v665_v55 = vmul.f32 1.442695, %v659_v53  ;;  %v660_v56 = vsub.f32 %v644_v41, %v656_v54  ;;  %v1119_v41 = vld [vmem:[%s1407_s4 + $0x8] sm:$0xff] }
 0x278   : > { %1152 = vpow2.f32 %v665_v55  ;;  %v667_v57 = vmul.f32 1.442695, %v660_v56  ;;  %v1190_v56 = vmov 32.0  }
 0x27a   : > { %1154 = vpow2.f32 %v667_v57 }
 0x27b   : > { %v647_v4 = vpop.xlane.xlu2 %646 }
 0x27c   : > { %v657_v5 = vsub.f32 %v641_v44, %v647_v4 }
 0x27e   : > { %v1153_v58 = vpop.eup %1152  ;;  %v661_v6 = vmul.f32 1.442695, %v657_v5  ;;  %v1120_v5 = vld [vmem:[%s1411_s8] sm:$0xff] }
 0x27f   : > { %v675_v59 = vsel %vm542_vm1, %v1153_v58, 0.0 }
 0x280   : > { %v1155_v60 = vpop.eup %1154  ;;  %676 = vadd.xlane.f32.xlu2 %v675_v59 }
 0x281   : > { %v678_v61 = vsel %vm542_vm1, %v1155_v60, 0.0 }
 0x282   : > { %679 = vadd.xlane.f32.xlu0 %v678_v61 }
 0x283   : > { %v650_v62 = vpop.xlane.xlu1 %649 }
 0x284   : > { %v658_v63 = vsub.f32 %v642_v49, %v650_v62 }
 0x286   : > { %v663_v0 = vmul.f32 1.442695, %v658_v63 }
 0x288   : > { %1156 = vpow2.f32 %v663_v0 }
 0x289   : > { %1158 = vpow2.f32 %v661_v6  ;;  %v1125_v6 = vld [vmem:[%s1413_s10 + $0x18] sm:$0xff] }
 0x28e   : > { %v1157_v1 = vpop.eup %1156 }
 0x28f   : > { %v672_v3 = vsel %vm542_vm1, %v1157_v1, 0.0  ;;  %v1159_v7 = vpop.eup %1158 }
 0x290   : > { %673 = vadd.xlane.f32.xlu1 %v672_v3  ;;  %v669_v8 = vsel %vm542_vm1, %v1159_v7, 0.0 }
 0x296   : > { %757 = vrot.lane.b32.xlu0 %v612_v24, %s1186_s21 }
 0x298   : > { %736 = vrot.lane.b32.xlu2 %v1306_v20, %s1186_s21 }
 0x29e   : > { %693 = vrot.lane.b32.xlu0 %v1300_v10, %s1186_s21 }
 0x2a9   : > { %715 = vrot.lane.b32.xlu1 %v1303_v14, %s1186_s21 }
 0x2d3   : > { %670 = vadd.xlane.f32.xlu1 %v669_v8 }
 0x2f3   : > { %v677_v9 = vpop.xlane.xlu2 %676 }
 0x2f4   : > { %1160 = vrcp.f32 %v677_v9  ;;  %v1124_v9 = vld [vmem:[%s1413_s10 + $0x10] sm:$0xff] }
 0x2f5   : > { %v680_v13 = vpop.xlane.xlu0 %679 }
 0x2f6   : > { %1162 = vrcp.f32 %v680_v13 }
 0x2fa   : > { %v1161_v11 = vpop.eup %1160 }
 0x2fb   : > { %v687_v12 = vmul.f32 %v1161_v11, %v1153_v58  ;;  %v737_v15 = vpop.permute.xlu2 %736 }
 0x2fc   : > { %v742_v16 = vsel %vm698_vm2, %v737_v15, 0  ;;  %v1163_v14 = vpop.eup %1162 }
 0x2fd   : > { %751 = vmatpush.bf16.msrb.mxu3 %v742_v16  ;;  %v691_v10 = vpack.c.bf16 %v687_v12, %v687_v12  ;;  %v688_v17 = vmul.f32 %v1163_v14, %v1155_v60 }
 0x2ff   : > { %v692_v20 = vpack.c.bf16 %v688_v17, %v688_v17  ;;  %v1146_v17 = vld [vmem:[%s1409_s6] ss:$0 sm:$0xff] }
 0x300   : > { %1077 = vmatmul.msk.bf16.vlgmr.msrb.gmra.mxu3 %vm542_vm1, %v691_v10 }
 0x301   : > { %950 = vmatpush.bf16.msra.mxu3 %v1125_v6 }
 0x303   : > { %v674_v21 = vpop.xlane.xlu1 %673 }
 0x304   : > { %1164 = vrcp.f32 %v674_v21 }
 0x305   : > { %951 = vmatpush.bf16.msra.mxu3 %v1124_v9 }
 0x308   : > { %v758_v18 = vpop.permute.xlu0 %757 }
 0x309   : > { %v763_v19 = vsel %vm698_vm2, %v758_v18, 0 }
 0x30a   : > { %772 = vmatpush.bf16.msra.mxu0 %v763_v19  ;;  %v1165_v24 = vpop.eup %1164  ;;  %v1147_v19 = vld [vmem:[%s1410_s7] ss:$0 sm:$0xff] }
 0x30b   : > { %v686_v25 = vmul.f32 %v1165_v24, %v1157_v1  ;;  %v1123_v24 = vld [vmem:[%s1413_s10 + $0x8] sm:$0xff] }
 0x30c   : > { %952 = vmatpush.bf16.msra.mxu3 %v1123_v24 }
 0x30d   : > { %1078 = vmatmul.msk.bf16.vlgmr.msra.gmra.mxu0 %vm542_vm1, %v692_v20  ;;  %v690_v28 = vpack.c.bf16 %v686_v25, %v686_v25  ;;  %v1122_v25 = vld [vmem:[%s1413_s10] sm:$0xff] }
 0x310   : > { %v694_v22 = vpop.permute.xlu0 %693  ;;  %953 = vmatpush.bf16.msra.mxu3 %v1122_v25 }
 0x311   : > { %v700_v23 = vsel %vm698_vm2, %v694_v22, 0 }
 0x312   : > { %709 = vmatpush.bf16.msrb.mxu1 %v700_v23 }
 0x316   : > { %820 = vmatpush.bf16.msra.mxu1 %v1119_v41 }
 0x31a   : > { %821 = vmatpush.bf16.msra.mxu1 %v1118_v42 }
 0x31b   : > { %v716_v26 = vpop.permute.xlu1 %715 }
 0x31c   : > { %v721_v27 = vsel %vm698_vm2, %v716_v26, 0  ;;  %v1148_v26 = vld [vmem:[%s1412_s9] ss:$0 sm:$0xff] }
 0x31d   : > { %730 = vmatpush.bf16.msrb.mxu2 %v721_v27 }
 0x320   : > { %1076 = vmatmul.msk.bf16.vlgmr.msrb.gmra.mxu2 %vm542_vm1, %v690_v28 }
 0x346   : > { %v671_v29 = vpop.xlane.xlu1 %670 }
 0x347   : > { %1166 = vrcp.f32 %v671_v29 }
 0x348   : > { %1168 = vrcp.f32 %v1190_v56 }
 0x34d   : > { %v1167_v30 = vpop.eup %1166 }
 0x34e   : > { %v685_v31 = vmul.f32 %v1167_v30, %v1159_v7  ;;  %v1169_v57 = vpop.eup %1168 }
 0x34f   : > { %v834_v58 = vmul.f32 32.0, %v1169_v57  ;;  %vm838_vm5 = vweird.f32 %v1169_v57 }
 0x350   : > { %v689_v32 = vpack.c.bf16 %v685_v31, %v685_v31 }
 0x351   : > { %v835_v59 = vsub.f32 1.0, %v834_v58 }
 0x352   : > { %1075 = vmatmul.msk.bf16.vlgmr.msrb.gmra.mxu1 %vm542_vm1, %v689_v32  ;;  %v1149_v32 = vld [vmem:[%s1414_s11] ss:$0 sm:$0xff] }
 0x353   : > { %v836_v60 = vmul.f32 %v1169_v57, %v835_v59 }
 0x355   : > { %v837_v61 = vadd.f32 %v1169_v57, %v836_v60 }
 0x357   : > { %v839_v62 = vsel %vm838_vm5, %v1169_v57, %v837_v61 }
 0x383   : > { %v753_v33 = vpop.f32.mrf.mxu3 }
 0x384   : > { %783 = vrot.lane.b32.xlu0 %v753_v33, %s1187_s22 }
 0x38a   : > { %v774_v34 = vpop.f32.mrf.mxu0 }
 0x38b   : > { %v755_v35 = vpop.f32.mrf.mxu3 }
 0x392   : > { %v776_v36 = vpop.f32.mrf.mxu0 }
 0x3a3   : > { %v732_v37 = vpop.f32.mrf.mxu2 }
 0x3a4   : > { %779 = vrot.lane.b32.xlu2 %v732_v37, %s1188_s23 }
 0x3ab   : > { %v734_v38 = vpop.f32.mrf.mxu2 }
 0x3ac   : > { %787 = vrot.lane.b32.xlu2 %v774_v34, %s1189_s24 }
 0x3cf   : > { %v711_v39 = vpop.f32.mrf.mxu1 }
 0x3d7   : > { %v713_v40 = vpop.f32.mrf.mxu1 }
 0x3f6   : > { %v784_v45 = vpop.permute.xlu0 %783 }
 0x3fe   : > { %v780_v43 = vpop.permute.xlu2 %779 }
 0x3ff   : > { %v790_v44 = vsel %vm542_vm1, %v711_v39, %v780_v43 }
 0x400   : > { %v792_v47 = vsel %vm791_vm3, %v790_v44, %v784_v45 }
 0x406   : > { %v788_v46 = vpop.permute.xlu2 %787 }
 0x407   : > { %v794_v48 = vsel %vm793_vm4, %v792_v47, %v788_v46 }
 0x408   : > { %v795_v49 = vpack.c.bf16 %v794_v48, %v794_v48 }
 0x40a   : > { %1087 = vmatmul.msk.bf16.vlgmr.msra.gmra.mxu1 %vm506_vm0, %v795_v49 }
 0x487   : > { %v823_v51 = vpop.f32.mrf.mxu1 }
 0x488   : > { %v824_v52 = vadd.f32 %v1145_v50, %v823_v51 }
 0x48a   : > { %v827_v53 = vadd.f32 %v824_v52, %v1292_v2  ;;  %v1121_v2 = vld [vmem:[%s1411_s8 + $0x8] sm:$0xff]  ;;  %v1150_v52 = vld [vmem:[%s1415_s12] ss:$0 sm:$0xff] }
 0x48b   : > { %906 = vmatpush.bf16.msra.mxu2 %v1121_v2 }
 0x48c   : > { %v830_v54 = vsel %vm506_vm0, %v827_v53, 0.0 }
 0x48d   : > { %831 = vadd.xlane.f32.xlu0 %v830_v54  ;;  %v1151_v54 = vld [vmem:[%s1416_s13] ss:$0 sm:$0xff] }
 0x48f   : > { %v825_v55 = vpop.f32.mrf.mxu1  ;;  %907 = vmatpush.bf16.msra.mxu2 %v1120_v5 }
 0x500   : > { %v832_v63 = vpop.xlane.xlu0 %831 }
 0x501   : > { %v840_v0 = vmul.f32 %v839_v62, %v832_v63 }
 0x503   : > { %v841_v1 = vsub.f32 %v827_v53, %v840_v0 }
 0x505   : > { %v842_v3 = vmul.f32 %v841_v1, %v841_v1 }
 0x507   : > { %v843_v4 = vsel %vm506_vm0, %v842_v3, 0.0 }
 0x508   : > { %844 = vadd.xlane.f32.xlu2 %v843_v4 }
 0x57b   : > { %v845_v7 = vpop.xlane.xlu2 %844 }
 0x57c   : > { %v846_v8 = vmul.f32 %v845_v7, %v839_v62 }
 0x57e   : > { %v847_v11 = vadd.f32 1e-05, %v846_v8 }
 0x580   : > { %1170 = vrsqrt.f32 %v847_v11  ;;  %vm854_vm7 = vweird.f32 %v847_v11 }
 0x586   : > { %v1171_v12 = vpop.eup %1170 }
 0x587   : > { %v849_v13 = vmul.f32 %v1171_v12, %v847_v11  ;;  %vm855_vm6 = vweird.f32 %v1171_v12 }
 0x588   : > { %vm856_vm8 = vmor %vm854_vm7, %vm855_vm6 }
 0x589   : > { %v850_v15 = vmul.f32 %v1171_v12, %v849_v13 }
 0x58b   : > { %v851_v16 = vmul.f32 0.5, %v850_v15 }
 0x58d   : > { %v852_v10 = vsub.f32 1.5, %v851_v16 }
 0x58f   : > { %v853_v14 = vmul.f32 %v1171_v12, %v852_v10 }
 0x591   : > { %v857_v18 = vsel %vm856_vm8, %v1171_v12, %v853_v14 }
 0x592   : > { %v858_v20 = vmul.f32 %v857_v18, %v841_v1 }
 0x594   : > { %v862_v21 = vmul.f32 %v1146_v17, %v858_v20 }
 0x596   : > { %v866_v22 = vadd.f32 %v1147_v19, %v862_v21 }
 0x598   : > { %v881_v23 = vpack.c.bf16 %v866_v22, %v866_v22 }
 0x59a   : > { %1096 = vmatmul.msk.bf16.vlgmr.msra.gmra.mxu2 %vm506_vm0, %v881_v23 }
 0x61d   : > { %v909_v27 = vpop.f32.mrf.mxu2 }
 0x61e   : > { %v910_v28 = vadd.f32 %v1148_v26, %v909_v27 }
 0x620   : > { %v913_v29 = vmax.f32 %v910_v28, 0.0 }
 0x622   : > { %v914_v30 = vpack.c.bf16 %v913_v29, %v913_v29 }
 0x624   : > { %1113 = vmatmul.msk.bf16.vlgmr.msra.gmra.mxu3 %vm942_vm9, %v914_v30 }
 0x625   : > { %v911_v31 = vpop.f32.mrf.mxu2 }
 0x6a7   : > { %v955_v33 = vpop.f32.mrf.mxu3 }
 0x6a8   : > { %v956_v34 = vadd.f32 %v1149_v32, %v955_v33 }
 0x6aa   : > { %v959_v35 = vadd.f32 %v956_v34, %v866_v22 }
 0x6ac   : > { %v962_v36 = vsel %vm506_vm0, %v959_v35, 0.0 }
 0x6ad   : > { %963 = vadd.xlane.f32.xlu1 %v962_v36 }
 0x6af   : > { %v957_v37 = vpop.f32.mrf.mxu3 }
 0x720   : > { %v964_v38 = vpop.xlane.xlu1 %963 }
 0x721   : > { %v965_v39 = vmul.f32 %v964_v38, %v839_v62 }
 0x723   : > { %v966_v40 = vsub.f32 %v959_v35, %v965_v39 }
 0x725   : > { %v967_v41 = vmul.f32 %v966_v40, %v966_v40 }
 0x727   : > { %v968_v42 = vsel %vm506_vm0, %v967_v41, 0.0 }
 0x728   : > { %969 = vadd.xlane.f32.xlu1 %v968_v42 }
 0x79b   : > { %v970_v43 = vpop.xlane.xlu1 %969 }
 0x79c   : > { %v971_v44 = vmul.f32 %v970_v43, %v839_v62 }
 0x79e   : > { %v972_v45 = vadd.f32 1e-05, %v971_v44 }
 0x7a0   : > { %1172 = vrsqrt.f32 %v972_v45  ;;  %vm979_vm11 = vweird.f32 %v972_v45 }
 0x7a6   : > { %v1173_v46 = vpop.eup %1172 }
 0x7a7   : > { %v974_v47 = vmul.f32 %v1173_v46, %v972_v45  ;;  %vm980_vm10 = vweird.f32 %v1173_v46 }
 0x7a8   : > { %vm981_vm12 = vmor %vm979_vm11, %vm980_vm10 }
 0x7a9   : > { %v975_v48 = vmul.f32 %v1173_v46, %v974_v47 }
 0x7ab   : > { %v976_v49 = vmul.f32 0.5, %v975_v48 }
 0x7ad   : > { %v977_v50 = vsub.f32 1.5, %v976_v49 }
 0x7af   : > { %v978_v51 = vmul.f32 %v1173_v46, %v977_v50 }
 0x7b1   : > { %v982_v53 = vsel %vm981_vm12, %v1173_v46, %v978_v51 }
 0x7b2   : > { %v983_v55 = vmul.f32 %v982_v53, %v966_v40 }
 0x7b4   : > { %v987_v56 = vmul.f32 %v1150_v52, %v983_v55 }
 0x7b6   : > { %v991_v57 = vadd.f32 %v1151_v54, %v987_v56 }
 0x7b8   : > { %992 = vst.msk [vmem:[%s476_s17] sm:$0xff] %vm506_vm0, %v991_v57 }
 0x7b9 PF: > { %s24_s29 = sadd.s32 1, %s1180_s29  }
 0x7ba   : > { %p21_p4 = scmp.ge.s32.totalorder %s24_s29, 4  }
 0x7bc   :  { %23 = sbr.rel (!%p21_p4) target bundleno = 1 (0x1), region = 109 }

// kernel: transformer_forward.3
= control target key start
LH: loop header
LB: loop body
LE: loop exit
PB: predicated region body
PF: predicated region fallthrough
CT: control target
= control target key end

     0   :  { %s2686_s0 = inlined_call_operand.vmem [shape: f32[2,8,32], index: 0, kind: input, shape index: {}]   ;;  %s2687_s1 = inlined_call_operand.vmem [shape: f32[2,8,32], index: 1, kind: input, shape index: {}]   ;;  %s2688_s2 = inlined_call_operand.vmem [shape: f32[2,1,8], index: 2, kind: input, shape index: {}]   ;;  %s2689_s3 = inlined_call_operand.vmem [shape: f32[2,8,8], index: 3, kind: input, shape index: {}]   ;;  %s2690_s4 = inlined_call_operand.vmem [shape: bf16[32,96], index: 4, kind: input, shape index: {}]   ;;  %s2691_s5 = inlined_call_operand.vmem [shape: f32[1,96], index: 5, kind: input, shape index: {}]   ;;  %s2692_s6 = inlined_call_operand.vmem [shape: bf16[32,32], index: 6, kind: input, shape index: {}]   ;;  %s2693_s7 = inlined_call_operand.vmem [shape: f32[1,32], index: 7, kind: input, shape index: {}]   ;;  %s2694_s8 = inlined_call_operand.vmem [shape: f32[1,32], index: 8, kind: input, shape index: {}]   ;;  %s2695_s9 = inlined_call_operand.vmem [shape: f32[1,32], index: 9, kind: input, shape index: {}]   ;;  %s2696_s10 = inlined_call_operand.vmem [shape: bf16[32,32], index: 10, kind: input, shape index: {}]   ;;  %s2697_s11 = inlined_call_operand.vmem [shape: f32[1,32], index: 11, kind: input, shape index: {}]   ;;  %s2698_s12 = inlined_call_operand.vmem [shape: bf16[32,64], index: 12, kind: input, shape index: {}]   ;;  %s2699_s13 = inlined_call_operand.vmem [shape: f32[1,64], index: 13, kind: input, shape index: {}]   ;;  %s2700_s14 = inlined_call_operand.vmem [shape: bf16[32,32], index: 14, kind: input, shape index: {}]   ;;  %s2701_s15 = inlined_call_operand.vmem [shape: f32[1,32], index: 15, kind: input, shape index: {}]   ;;  %s2702_s16 = inlined_call_operand.vmem [shape: f32[1,32], index: 16, kind: input, shape index: {}]   ;;  %s2703_s17 = inlined_call_operand.vmem [shape: f32[1,32], index: 17, kind: input, shape index: {}]   ;;  %s2704_s18 = inlined_call_operand.vmem [shape: bf16[32,64], index: 18, kind: input, shape index: {}]   ;;  %s2705_s19 = inlined_call_operand.vmem [shape: f32[1,64], index: 19, kind: input, shape index: {}]   ;;  %s2706_s20 = inlined_call_operand.vmem [shape: bf16[64,32], index: 20, kind: input, shape index: {}]   ;;  %s2707_s21 = inlined_call_operand.vmem [shape: f32[1,32], index: 21, kind: input, shape index: {}]   ;;  %s2708_s22 = inlined_call_operand.vmem [shape: f32[1,32], index: 22, kind: input, shape index: {}]   ;;  %s2709_s23 = inlined_call_operand.vmem [shape: f32[1,32], index: 23, kind: input, shape index: {}]   ;;  %s2710_s24 = inlined_call_operand.vmem [shape: bf16[32,16], index: 24, kind: input, shape index: {}]   ;;  %s2711_s25 = inlined_call_operand.vmem [shape: f32[1,16], index: 25, kind: input, shape index: {}]   ;;  %s2712_s26 = inlined_call_operand.hbm [shape: f32[2,8,16], index: 26, kind: output, shape index: {}]  }
   0x1   :  { %2735 = sst [smem:[#allocation10_spill]] %s2686_s0 }
   0x2   :  { %2736 = sst [smem:[#allocation11_spill]] %s2687_s1 }
   0x3   :  { %2737 = sst [smem:[#allocation12_spill]] %s2688_s2 }
   0x4   :  { %2738 = sst [smem:[#allocation13_spill]] %s2689_s3 }
   0x5   :  { %2739 = sst [smem:[#allocation14_spill]] %s2690_s4 }
   0x6   :  { %2740 = sst [smem:[#allocation15_spill]] %s2691_s5 }
   0x7   :  { %2741 = sst [smem:[#allocation16_spill]] %s2692_s6 }
   0x8   :  { %2742 = sst [smem:[#allocation17_spill]] %s2693_s7 }
   0x9   :  { %2743 = sst [smem:[#allocation18_spill]] %s2694_s8 }
   0xa   :  { %2744 = sst [smem:[#allocation19_spill]] %s2695_s9 }
   0xb   :  { %2745 = sst [smem:[#allocation20_spill]] %s2696_s10 }
   0xc   :  { %2746 = sst [smem:[#allocation21_spill]] %s2697_s11 }
   0xd   :  { %2747 = sst [smem:[#allocation22_spill]] %s2698_s12 }
   0xe   :  { %31 = vsyncpa [#allocation3], 0 }
   0xf   :  { %33 = vsyncpa [#allocation3 + $0x1], 0  ;;  %s2350_s27 = smov 0   ;;  %s2352_s3 = smov 0  }
  0x10   :  { %s2354_s7 = smov 0   ;;  %s2356_s28 = smov 0  }
  0x11 LB: > { %2748 = sst [smem:[#allocation5_spill]] %s2192_s27  ;;  %s2371_s8 = sadd.s32 4294967295, %s2204_s28   ;;  %s2204_s28 = sphi %s2356_s28, %s2778_s28   ;;  %s2200_s7 = sphi %s2354_s7, %s2780_s7   ;;  %s2196_s3 = sphi %s2352_s3, %s2782_s3   ;;  %s2192_s27 = sphi %s2350_s27, %s2781_s27  }
  0x12   : > { %2749 = sst [smem:[#allocation6_spill]] %s2200_s7  ;;  %s1913_s4 = sadd.s32 4294967294, %s2204_s28  }
  0x13   : > { %s2375_s29 = sadd.s32 1, %s2204_s28   ;;  %s612_s0 = sadd.s32 1, %s2200_s7 }
  0x14   : > { %2750 = sst [smem:[#allocation7_spill]] %s2375_s29  ;;  %s609_s9 = ssub.s32 %s2204_s28, %s2375_s29 }
  0x15   : > { %p622_p0 = scmp.ne.s32.totalorder %s2200_s7, %s2196_s3  ;;  %p610_p1 = scmp.eq.s32.totalorder %s609_s9, 0 }
  0x16   : > { %p623_p2 = scmp.eq.s32.totalorder %s2371_s8, 1  ;;  %p628_p3 = scmp.ne.s32.totalorder %s2196_s3, %s2192_s27 }
  0x17   : > { %p629_p4 = scmp.eq.s32.totalorder %s1913_s4, 1  ;;  %p1916_p7 = scmp.ge.s32.totalorder %s2204_s28, 1 }
  0x18   : > { %s2386_s30 = scalar_select %p610_p1, %s2200_s7, %s612_s0  }
  0x19   : > { %p2388_p5 = por %p623_p2, %p622_p0  ;;  %p2392_p6 = por %p629_p4, %p628_p3 }
  0x1a   : > { %2751 = sst [smem:[#allocation8_spill]] %s2386_s30  ;;  %p740_p8 = scmp.lt.s32.totalorder %s2204_s28, 3 }
  0x1b   : > { %s2753_s5 = scalar_select %p2392_p6, 1, 0 }
  0x1c   : > { %p741_p9 = pnand %p1916_p7, %p740_p8 }
  0x1d   : > { %2754 = sst [smem:[#allocation9_spill]] %s2753_s5  ;;  %p820_p10 = scmp.lt.s32.totalorder (!%p741_p9), %s2371_s8, 1 }
  0x1e   : > { %744 = sbr.rel (%p741_p9) target bundleno = 3459 (0xd83), region = 124  ;;  %s2755_s1 = sld [smem:[#allocation14_spill]] (!%p741_p9) }
  0x1f   : > { %s2756_s5 = sld [smem:[#allocation10_spill]] (!%p741_p9)  ;;  %s2725_s0 = smov (!%p741_p9), 104  }
  0x20   : > { %s2757_s4 = sld [smem:[#allocation15_spill]] (!%p741_p9)  ;;  %s2723_s7 = smov (!%p741_p9), 120  }
  0x21   : > { %s2721_s29 = smov (!%p741_p9), 96   ;;  %s2758_s6 = sld [smem:[#allocation13_spill]] (!%p741_p9) }
  0x22   : > { %s2729_s10 = smov (!%p741_p9), 16   ;;  %s2763_s12 = sld [smem:[#allocation22_spill]] (!%p741_p9) }
  0x23   : > { %s2406_s9 = scalar_select %p820_p10, %s2371_s8, 1  ;;  %vm866_vm0 = vcmask 261120   ;;  %vm902_vm1 = vcmask 64512   ;;  %vm1055_vm2 = vcmask 1043456   ;;  %vm1148_vm3 = vcmask 130048  }
  0x24   : > { %v2022_v0 = vld [vmem:[%s2755_s1 + $0x8] sm:$0xff]  ;;  %v2021_v1 = vld [vmem:[%s2755_s1] sm:$0xff]  ;;  %vm1150_vm4 = vcmask 195584   ;;  %s2767_s1 = sld [smem:[#allocation18_spill]]  ;;  %vm1717_vm12 = vcmask 523264  }
  0x25   : > { %876 = vmatpush.bf16.msra.mxu0 %v2022_v0  ;;  %s2409_s30 = sshll.u32 %s2406_s9, 3  ;;  %s2769_s11 = sld [smem:[#allocation21_spill]] }
  0x26   : > { %s823_s27 = scalar_lea.vmem %s2756_s5, %s2409_s30  ;;  %v2087_v4 = vld [vmem:[%s2757_s4] ss:$0 sm:$0xff]  ;;  %s2210_s5 = smov 64  }
  0x27   : > { %v2415_v2 = vld [vmem:[%s823_s27] sm:$0xff]  ;;  %s2727_s27 = smov 112   ;;  %s834_s4 = scalar_lea.vmem %s2758_s6, %s2409_s30 }
  0x28   : > { %v850_v3 = vpack.c.bf16 %v2415_v2, %v2415_v2  ;;  %v839_v36 = vld [vmem:[%s834_s4] sm:$0xff]  ;;  %s2731_s6 = smov 8   ;;  %s2730_s4 = smov 24  }
  0x29   : > { %877 = vmatpush.bf16.msra.mxu0 %v2021_v1 }
  0x2c   : > { %1929 = vmatmul.msk.bf16.vlgmr.msra.gmra.mxu0 %vm866_vm0, %v850_v3 }
  0xa9   : > { %v879_v5 = vpop.f32.mrf.mxu0 }
  0xaa   : > { %v880_v6 = vadd.f32 %v2087_v4, %v879_v5 }
  0xac   : > { %890 = vrot.lane.b32.xlu1 %v880_v6, %s2725_s0  ;;  %884 = vrot.lane.b32.xlu0 %v880_v6, %s2723_s7  ;;  %v893_v8 = vpack.c.bf16 %v880_v6, %v880_v6  ;;  %s2759_s7 = sld [smem:[#allocation16_spill]] }
  0xae   : > { %v898_v9 = vunpack.c.l.b16 %v893_v8 }
  0xb0   : > { %v2426_v10 = vpack.c.b16 %v898_v9, %v898_v9 }
  0xb1   : > { %v881_v7 = vpop.f32.mrf.mxu0 }
  0xb2   : > { %s2760_s0 = smov %s2759_s7 }
  0xb4   : > { %887 = vrot.lane.b32.xlu0 %v880_v6, %s2727_s27  ;;  %s2761_s27 = sld [smem:[#allocation17_spill]] }
  0xbc   : > { %900 = vrot.lane.b32.xlu0 %v2426_v10, %s2721_s29 }
 0x11e   : > { %v885_v11 = vpop.permute.xlu0 %884  ;;  %v891_v17 = vpop.permute.xlu1 %890 }
 0x11f   : > { %v894_v12 = vpack.c.bf16 %v885_v11, %v885_v11  ;;  %v896_v19 = vpack.c.bf16 %v891_v17, %v891_v17 }
 0x121   : > { %v923_v13 = vunpack.c.l.b16 %v894_v12  ;;  %v971_v22 = vunpack.c.l.b16 %v896_v19 }
 0x123   : > { %v2430_v14 = vpack.c.b16 %v923_v13, %v923_v13  ;;  %v972_v24 = vpack.c.b16 %v971_v22, %v971_v22 }
 0x125   : > { %925 = vrot.lane.b32.xlu1 %v2430_v14, %s2721_s29 }
 0x126   : > { %v888_v15 = vpop.permute.xlu0 %887 }
 0x127   : > { %v895_v16 = vpack.c.bf16 %v888_v15, %v888_v15 }
 0x129   : > { %v947_v18 = vunpack.c.l.b16 %v895_v16 }
 0x12b   : > { %v2434_v20 = vpack.c.b16 %v947_v18, %v947_v18 }
 0x12d   : > { %949 = vrot.lane.b32.xlu2 %v2434_v20, %s2721_s29 }
 0x12e   : > { %v901_v21 = vpop.permute.xlu0 %900 }
 0x12f   : > { %v907_v23 = vsel %vm902_vm1, %v901_v21, 0 }
 0x130   : > { %916 = vmatpush.bf16.xpose.msra.mxu1 %v907_v23 }
 0x135   : > { %973 = vrot.lane.b32.xlu2 %v972_v24, %s2721_s29 }
 0x137   : > { %1930 = vmatmul.msk.bf16.vlgmr.msra.gmra.mxu1 %vm902_vm1, %v893_v8 }
 0x187   : > { %v950_v25 = vpop.permute.xlu2 %949 }
 0x188   : > { %v955_v26 = vsel %vm902_vm1, %v950_v25, 0 }
 0x189   : > { %964 = vmatpush.bf16.xpose.msra.mxu3 %v955_v26 }
 0x18f   : > { %v974_v27 = vpop.permute.xlu2 %973 }
 0x190   : > { %1932 = vmatmul.msk.bf16.vlgmr.msra.gmra.mxu3 %vm902_vm1, %v895_v16  ;;  %v979_v28 = vsel %vm902_vm1, %v974_v27, 0 }
 0x191   : > { %988 = vmatpush.bf16.xpose.msrb.mxu0 %v979_v28 }
 0x197   : > { %v926_v29 = vpop.permute.xlu1 %925 }
 0x198   : > { %1933 = vmatmul.msk.bf16.vlgmr.msrb.gmra.mxu0 %vm902_vm1, %v896_v19  ;;  %v931_v30 = vsel %vm902_vm1, %v926_v29, 0 }
 0x199   : > { %940 = vmatpush.bf16.xpose.msra.mxu2 %v931_v30 }
 0x1a0   : > { %1931 = vmatmul.msk.bf16.vlgmr.msra.gmra.mxu2 %vm902_vm1, %v894_v12 }
 0x1b4   : > { %v918_v31 = vpop.f32.mrf.mxu1 }
 0x1b5   : > { %v994_v39 = vmul.f32 0.35355338, %v918_v31 }
 0x1b7   : > { %v998_v44 = vadd.f32 %v994_v39, %v839_v36 }
 0x1b9   : > { %v1002_v46 = vsel %vm902_vm1, %v998_v44, -inf }
 0x1bc   : > { %v920_v32 = vpop.f32.mrf.mxu1 }
 0x213   : > { %v966_v33 = vpop.f32.mrf.mxu3 }
 0x214   : > { %v996_v34 = vmul.f32 0.35355338, %v966_v33 }
 0x215   : > { %v990_v35 = vpop.f32.mrf.mxu0 }
 0x216   : > { %v997_v37 = vmul.f32 0.35355338, %v990_v35  ;;  %v1000_v38 = vadd.f32 %v996_v34, %v839_v36 }
 0x218   : > { %v1008_v40 = vsel %vm902_vm1, %v1000_v38, -inf  ;;  %v1001_v41 = vadd.f32 %v997_v37, %v839_v36 }
 0x219   : > { %1009 = vmax.xlane.f32.xlu2 %v1008_v40 }
 0x21a   : > { %v1011_v42 = vsel %vm902_vm1, %v1001_v41, -inf }
 0x21b   : > { %v968_v43 = vpop.f32.mrf.mxu3  ;;  %1012 = vmax.xlane.f32.xlu0 %v1011_v42  ;;  %v2023_v42 = vld [vmem:[%s2760_s0] sm:$0xff]  ;;  %s2764_s0 = sld [smem:[#allocation20_spill]] }
 0x21d   : > { %v992_v45 = vpop.f32.mrf.mxu0 }
 0x221   : > { %1003 = vmax.xlane.f32.xlu2 %v1002_v46 }
 0x223   : > { %v942_v47 = vpop.f32.mrf.mxu2 }
 0x224   : > { %v995_v48 = vmul.f32 0.35355338, %v942_v47 }
 0x226   : > { %v999_v49 = vadd.f32 %v995_v48, %v839_v36 }
 0x228   : > { %v1005_v50 = vsel %vm902_vm1, %v999_v49, -inf }
 0x229   : > { %1006 = vmax.xlane.f32.xlu1 %v1005_v50  ;;  %v2088_v50 = vld [vmem:[%s2761_s27] ss:$0 sm:$0xff]  ;;  %s2768_s27 = sld [smem:[#allocation19_spill]] }
 0x22b   : > { %v944_v51 = vpop.f32.mrf.mxu2 }
 0x28c   : > { %v1010_v52 = vpop.xlane.xlu2 %1009 }
 0x28d   : > { %v1016_v53 = vsub.f32 %v1000_v38, %v1010_v52 }
 0x28e   : > { %v1013_v54 = vpop.xlane.xlu0 %1012 }
 0x28f   : > { %v1022_v55 = vmul.f32 1.442695, %v1016_v53  ;;  %v1017_v56 = vsub.f32 %v1001_v41, %v1013_v54  ;;  %v2024_v41 = vld [vmem:[%s2759_s7 + $0x8] sm:$0xff]  ;;  %s2766_s7 = smov 104  }
 0x291   : > { %2102 = vpow2.f32 %v1022_v55  ;;  %v1024_v57 = vmul.f32 1.442695, %v1017_v56  ;;  %v2214_v56 = vmov 32.0  }
 0x293   : > { %2104 = vpow2.f32 %v1024_v57  ;;  %v2028_v57 = vld [vmem:[%s2763_s12 + $0x8] sm:$0xff] }
 0x294   : > { %v1004_v4 = vpop.xlane.xlu2 %1003 }
 0x295   : > { %v1014_v5 = vsub.f32 %v998_v44, %v1004_v4 }
 0x297   : > { %v2103_v58 = vpop.eup %2102  ;;  %v1018_v6 = vmul.f32 1.442695, %v1014_v5 }
 0x298   : > { %v1032_v59 = vsel %vm902_vm1, %v2103_v58, 0.0 }
 0x299   : > { %v2105_v60 = vpop.eup %2104  ;;  %1033 = vadd.xlane.f32.xlu2 %v1032_v59 }
 0x29a   : > { %v1035_v61 = vsel %vm902_vm1, %v2105_v60, 0.0 }
 0x29b   : > { %1036 = vadd.xlane.f32.xlu0 %v1035_v61 }
 0x29c   : > { %v1007_v62 = vpop.xlane.xlu1 %1006 }
 0x29d   : > { %v1015_v63 = vsub.f32 %v999_v49, %v1007_v62 }
 0x29f   : > { %v1020_v0 = vmul.f32 1.442695, %v1015_v63 }
 0x2a1   : > { %2106 = vpow2.f32 %v1020_v0 }
 0x2a2   : > { %2108 = vpow2.f32 %v1018_v6 }
 0x2a7   : > { %v2107_v1 = vpop.eup %2106 }
 0x2a8   : > { %v1029_v3 = vsel %vm902_vm1, %v2107_v1, 0.0  ;;  %v2109_v7 = vpop.eup %2108 }
 0x2a9   : > { %1030 = vadd.xlane.f32.xlu1 %v1029_v3  ;;  %v1026_v8 = vsel %vm902_vm1, %v2109_v7, 0.0 }
 0x2af   : > { %1114 = vrot.lane.b32.xlu0 %v972_v24, %s2210_s5 }
 0x2b1   : > { %1093 = vrot.lane.b32.xlu2 %v2434_v20, %s2210_s5 }
 0x2b7   : > { %1050 = vrot.lane.b32.xlu0 %v2426_v10, %s2210_s5 }
 0x2c2   : > { %1072 = vrot.lane.b32.xlu1 %v2430_v14, %s2210_s5  ;;  %s2765_s5 = smov 112  }
 0x2ec   : > { %1027 = vadd.xlane.f32.xlu1 %v1026_v8  ;;  %v2026_v8 = vld [vmem:[%s2764_s0 + $0x8] sm:$0xff] }
 0x30c   : > { %v1034_v9 = vpop.xlane.xlu2 %1033 }
 0x30d   : > { %2110 = vrcp.f32 %v1034_v9  ;;  %v2025_v9 = vld [vmem:[%s2764_s0] sm:$0xff] }
 0x30e   : > { %v1037_v13 = vpop.xlane.xlu0 %1036 }
 0x30f   : > { %2112 = vrcp.f32 %v1037_v13 }
 0x313   : > { %v2111_v11 = vpop.eup %2110 }
 0x314   : > { %v1044_v12 = vmul.f32 %v2111_v11, %v2103_v58  ;;  %v1094_v15 = vpop.permute.xlu2 %1093  ;;  %v2091_v11 = vld [vmem:[%s2699_s13] ss:$0 sm:$0xff] }
 0x315   : > { %v1099_v16 = vsel %vm1055_vm2, %v1094_v15, 0  ;;  %v2113_v14 = vpop.eup %2112 }
 0x316   : > { %1108 = vmatpush.bf16.msrb.mxu3 %v1099_v16  ;;  %v1048_v10 = vpack.c.bf16 %v1044_v12, %v1044_v12  ;;  %v1045_v17 = vmul.f32 %v2113_v14, %v2105_v60 }
 0x318   : > { %v1049_v20 = vpack.c.bf16 %v1045_v17, %v1045_v17 }
 0x319   : > { %1936 = vmatmul.msk.bf16.vlgmr.msrb.gmra.mxu3 %vm902_vm1, %v1048_v10 }
 0x31a   : > { %1296 = vmatpush.bf16.msra.mxu3 %v2028_v57 }
 0x31c   : > { %v1031_v21 = vpop.xlane.xlu1 %1030 }
 0x31d   : > { %2114 = vrcp.f32 %v1031_v21 }
 0x321   : > { %v1115_v18 = vpop.permute.xlu0 %1114 }
 0x322   : > { %v1120_v19 = vsel %vm1055_vm2, %v1115_v18, 0 }
 0x323   : > { %1129 = vmatpush.bf16.msra.mxu0 %v1120_v19  ;;  %v2115_v24 = vpop.eup %2114 }
 0x324   : > { %v1043_v25 = vmul.f32 %v2115_v24, %v2107_v1 }
 0x326   : > { %1937 = vmatmul.msk.bf16.vlgmr.msra.gmra.mxu0 %vm902_vm1, %v1049_v20  ;;  %v1047_v28 = vpack.c.bf16 %v1043_v25, %v1043_v25  ;;  %v2089_v25 = vld [vmem:[%s2767_s1] ss:$0 sm:$0xff] }
 0x329   : > { %v1051_v22 = vpop.permute.xlu0 %1050 }
 0x32a   : > { %v1057_v23 = vsel %vm1055_vm2, %v1051_v22, 0 }
 0x32b   : > { %1066 = vmatpush.bf16.msrb.mxu1 %v1057_v23 }
 0x32f   : > { %1177 = vmatpush.bf16.msra.mxu1 %v2024_v41 }
 0x333   : > { %1178 = vmatpush.bf16.msra.mxu1 %v2023_v42 }
 0x334   : > { %v1073_v26 = vpop.permute.xlu1 %1072 }
 0x335   : > { %v1078_v27 = vsel %vm1055_vm2, %v1073_v26, 0 }
 0x336   : > { %1087 = vmatpush.bf16.msrb.mxu2 %v1078_v27  ;;  %v2090_v27 = vld [vmem:[%s2768_s27] ss:$0 sm:$0xff] }
 0x339   : > { %1935 = vmatmul.msk.bf16.vlgmr.msrb.gmra.mxu2 %vm902_vm1, %v1047_v28 }
 0x33a   : > { %1264 = vmatpush.bf16.msra.mxu2 %v2026_v8 }
 0x33e   : > { %1265 = vmatpush.bf16.msra.mxu2 %v2025_v9 }
 0x35f   : > { %v1028_v29 = vpop.xlane.xlu1 %1027 }
 0x360   : > { %2116 = vrcp.f32 %v1028_v29 }
 0x361   : > { %2118 = vrcp.f32 %v2214_v56 }
 0x366   : > { %v2117_v30 = vpop.eup %2116 }
 0x367   : > { %v1042_v31 = vmul.f32 %v2117_v30, %v2109_v7  ;;  %v2119_v59 = vpop.eup %2118 }
 0x368   : > { %v1191_v61 = vmul.f32 32.0, %v2119_v59  ;;  %vm1195_vm5 = vweird.f32 %v2119_v59 }
 0x369   : > { %v1046_v32 = vpack.c.bf16 %v1042_v31, %v1042_v31 }
 0x36a   : > { %v1192_v62 = vsub.f32 1.0, %v1191_v61 }
 0x36b   : > { %1934 = vmatmul.msk.bf16.vlgmr.msrb.gmra.mxu1 %vm902_vm1, %v1046_v32 }
 0x36c   : > { %v1193_v63 = vmul.f32 %v2119_v59, %v1192_v62 }
 0x36e   : > { %v1194_v0 = vadd.f32 %v2119_v59, %v1193_v63 }
 0x370   : > { %v2499_v1 = vsel %vm1195_vm5, %v2119_v59, %v1194_v0 }
 0x39c   : > { %v1110_v33 = vpop.f32.mrf.mxu3 }
 0x39d   : > { %1140 = vrot.lane.b32.xlu0 %v1110_v33, %s2729_s10  ;;  %s2775_s10 = smov 24  }
 0x3a3   : > { %v1131_v34 = vpop.f32.mrf.mxu0 }
 0x3a4   : > { %v1112_v35 = vpop.f32.mrf.mxu3 }
 0x3a5   : > { %v2092_v35 = vld [vmem:[%s2769_s11] ss:$0 sm:$0xff] }
 0x3ab   : > { %v1133_v36 = vpop.f32.mrf.mxu0 }
 0x3bc   : > { %v1089_v37 = vpop.f32.mrf.mxu2 }
 0x3bd   : > { %1136 = vrot.lane.b32.xlu2 %v1089_v37, %s2731_s6 }
 0x3c4   : > { %v1091_v38 = vpop.f32.mrf.mxu2 }
 0x3c5   : > { %1144 = vrot.lane.b32.xlu2 %v1131_v34, %s2730_s4  ;;  %s2762_s4 = sld [smem:[#allocation11_spill]] }
 0x3cb   : > { %s827_s6 = scalar_lea.vmem %s2762_s4, %s2409_s30  ;;  %s2770_s30 = smov 120  }
 0x3cc   : > { %v837_v58 = vld [vmem:[%s827_s6] sm:$0xff]  ;;  %s2771_s4 = sld [smem:[#allocation12_spill]] }
 0x3cd   : > { %v1271_v60 = vpack.c.bf16 %v837_v58, %v837_v58 }
 0x3d2   : > { %s830_s27 = scalar_lea.vmem %s2771_s4, %s2406_s9  ;;  %s2772_s9 = smov 96  }
 0x3d3   : > { %v2093_v56 = vld [vmem:[%s830_s27] ss:$0 sm:$0xff]  ;;  %s817_s4 = sand.u32 1, %s2196_s3   ;;  %s2018_s27 = sshll.u32 %s2371_s8, 3 }
 0x3d4   : > { %s1806_s8 = scalar_lea.sflag [#allocation3], %s817_s4 }
 0x3e8   : > { %v1068_v39 = vpop.f32.mrf.mxu1 }
 0x3f0   : > { %v1070_v40 = vpop.f32.mrf.mxu1 }
 0x40f   : > { %v1141_v45 = vpop.permute.xlu0 %1140 }
 0x417   : > { %v1137_v43 = vpop.permute.xlu2 %1136 }
 0x418   : > { %v1147_v44 = vsel %vm902_vm1, %v1068_v39, %v1137_v43 }
 0x419   : > { %v1149_v47 = vsel %vm1148_vm3, %v1147_v44, %v1141_v45 }
 0x41f   : > { %v1145_v46 = vpop.permute.xlu2 %1144 }
 0x420   : > { %v1151_v48 = vsel %vm1150_vm4, %v1149_v47, %v1145_v46 }
 0x421   : > { %v1152_v49 = vpack.c.bf16 %v1151_v48, %v1151_v48 }
 0x423   : > { %1946 = vmatmul.msk.bf16.vlgmr.msra.gmra.mxu1 %vm866_vm0, %v1152_v49 }
 0x4a0   : > { %v1180_v51 = vpop.f32.mrf.mxu1 }
 0x4a1   : > { %v1181_v52 = vadd.f32 %v2088_v50, %v1180_v51 }
 0x4a3   : > { %v1184_v53 = vadd.f32 %v1181_v52, %v2415_v2  ;;  %v2027_v2 = vld [vmem:[%s2763_s12] sm:$0xff] }
 0x4a4   : > { %1297 = vmatpush.bf16.msra.mxu3 %v2027_v2 }
 0x4a5   : > { %v1187_v54 = vsel %vm866_vm0, %v1184_v53, 0.0 }
 0x4a6   : > { %1188 = vadd.xlane.f32.xlu0 %v1187_v54 }
 0x4a7   : > { %1964 = vmatmul.msk.bf16.vlgmr.msra.gmra.mxu3 %vm866_vm0, %v1271_v60 }
 0x4a8   : > { %v1182_v55 = vpop.f32.mrf.mxu1 }
 0x519   : > { %v1189_v3 = vpop.xlane.xlu0 %1188 }
 0x51a   : > { %v1197_v4 = vmul.f32 %v2499_v1, %v1189_v3 }
 0x51c   : > { %v1198_v5 = vsub.f32 %v1184_v53, %v1197_v4 }
 0x51e   : > { %v1199_v6 = vmul.f32 %v1198_v5, %v1198_v5 }
 0x520   : > { %v1200_v7 = vsel %vm866_vm0, %v1199_v6, 0.0 }
 0x521   : > { %1201 = vadd.xlane.f32.xlu2 %v1200_v7 }
 0x52a   : > { %v1299_v12 = vpop.f32.mrf.mxu3 }
 0x52b   : > { %v1300_v16 = vadd.f32 %v2091_v11, %v1299_v12 }
 0x52d   : > { %1317 = vrot.lane.b32.xlu1 %v1300_v16, %s2765_s5  ;;  %1320 = vrot.lane.b32.xlu0 %v1300_v16, %s2766_s7  ;;  %v2515_v14 = vpack.c.bf16 %v1300_v16, %v1300_v16 }
 0x52f   : > { %v1335_v17 = vsel %vm902_vm1, %v2515_v14, 0 }
 0x530   : > { %1344 = vmatpush.bf16.xpose.msrb.mxu0 %v1335_v17 }
 0x532   : > { %v1301_v18 = vpop.f32.mrf.mxu3 }
 0x594   : > { %v1202_v13 = vpop.xlane.xlu2 %1201 }
 0x595   : > { %v1203_v15 = vmul.f32 %v1202_v13, %v2499_v1 }
 0x597   : > { %v1204_v10 = vadd.f32 1e-05, %v1203_v15 }
 0x599   : > { %2120 = vrsqrt.f32 %v1204_v10  ;;  %vm1211_vm7 = vweird.f32 %v1204_v10 }
 0x59f   : > { %v2121_v19 = vpop.eup %2120  ;;  %v1318_v32 = vpop.permute.xlu1 %1317 }
 0x5a0   : > { %v1206_v20 = vmul.f32 %v2121_v19, %v1204_v10  ;;  %vm1212_vm6 = vweird.f32 %v2121_v19  ;;  %v2530_v33 = vpack.c.bf16 %v1318_v32, %v1318_v32  ;;  %v1321_v40 = vpop.permute.xlu0 %1320 }
 0x5a1   : > { %vm1213_vm8 = vmor %vm1211_vm7, %vm1212_vm6  ;;  %v2546_v41 = vpack.c.bf16 %v1321_v40, %v1321_v40 }
 0x5a2   : > { %v1207_v21 = vmul.f32 %v2121_v19, %v1206_v20  ;;  %v1373_v34 = vsel %vm902_vm1, %v2530_v33, 0 }
 0x5a3   : > { %1382 = vmatpush.bf16.xpose.msrb.mxu2 %v1373_v34  ;;  %v1392_v42 = vsel %vm902_vm1, %v2546_v41, 0 }
 0x5a4   : > { %v1208_v22 = vmul.f32 0.5, %v1207_v21  ;;  %1401 = vmatpush.bf16.xpose.msrb.mxu3 %v1392_v42 }
 0x5a6   : > { %v1209_v23 = vsub.f32 1.5, %v1208_v22 }
 0x5a8   : > { %v1210_v24 = vmul.f32 %v2121_v19, %v1209_v23 }
 0x5aa   : > { %v1214_v26 = vsel %vm1213_vm8, %v2121_v19, %v1210_v24  ;;  %v1515_v19 = vunpack.c.l.b16 %v2530_v33 }
 0x5ab   : > { %v1215_v28 = vmul.f32 %v1214_v26, %v1198_v5  ;;  %v1467_v26 = vunpack.c.l.b16 %v2515_v14 }
 0x5ac   : > { %v1516_v23 = vpack.c.b16 %v1515_v19, %v1515_v19 }
 0x5ad   : > { %v1219_v29 = vmul.f32 %v2089_v25, %v1215_v28 }
 0x5af   : > { %v2525_v30 = vadd.f32 %v2090_v27, %v1219_v29  ;;  %v1468_v27 = vpack.c.b16 %v1467_v26, %v1467_v26 }
 0x5b1   : > { %v1239_v31 = vpack.c.bf16 %v2525_v30, %v2525_v30 }
 0x5b3   : > { %1955 = vmatmul.msk.bf16.vlgmr.msra.gmra.mxu2 %vm866_vm0, %v1239_v31  ;;  %v1539_v31 = vunpack.c.l.b16 %v2546_v41 }
 0x5b5   : > { %v1540_v32 = vpack.c.b16 %v1539_v31, %v1539_v31  ;;  %v2036_v31 = vld [vmem:[%s2706_s20 + $0x18] sm:$0xff] }
 0x636   : > { %v1267_v36 = vpop.f32.mrf.mxu2 }
 0x637   : > { %v1268_v37 = vadd.f32 %v2092_v35, %v1267_v36 }
 0x639   : > { %v1323_v38 = vpack.c.bf16 %v1268_v37, %v1268_v37  ;;  %1304 = vrot.lane.b32.xlu0 %v1268_v37, %s2770_s30  ;;  %1310 = vrot.lane.b32.xlu1 %v1268_v37, %s2766_s7  ;;  %s2774_s7 = smov 8  }
 0x63a   : > { %1307 = vrot.lane.b32.xlu2 %v1268_v37, %s2765_s5  ;;  %s2773_s5 = smov 16  }
 0x63b   : > { %1965 = vmatmul.msk.bf16.vlgmr.msrb.gmra.mxu0 %vm902_vm1, %v1323_v38 }
 0x63e   : > { %v1269_v39 = vpop.f32.mrf.mxu2 }
 0x641   : > { %1314 = vrot.lane.b32.xlu1 %v1300_v16, %s2770_s30 }
 0x694   : > { %v1308_v43 = vpop.permute.xlu2 %1307 }
 0x695   : > { %v1325_v44 = vpack.c.bf16 %v1308_v43, %v1308_v43 }
 0x697   : > { %1967 = vmatmul.msk.bf16.vlgmr.msrb.gmra.mxu2 %vm902_vm1, %v1325_v44 }
 0x6ab   : > { %v1311_v45 = vpop.permute.xlu1 %1310  ;;  %v1305_v51 = vpop.permute.xlu0 %1304 }
 0x6ac   : > { %v1326_v46 = vpack.c.bf16 %v1311_v45, %v1311_v45  ;;  %v1324_v52 = vpack.c.bf16 %v1305_v51, %v1305_v51 }
 0x6ae   : > { %1968 = vmatmul.msk.bf16.vlgmr.msrb.gmra.mxu3 %vm902_vm1, %v1326_v46 }
 0x6b3   : > { %v1315_v47 = vpop.permute.xlu1 %1314 }
 0x6b4   : > { %v2552_v48 = vpack.c.bf16 %v1315_v47, %v1315_v47 }
 0x6b6   : > { %v1354_v49 = vsel %vm902_vm1, %v2552_v48, 0  ;;  %v1491_v33 = vunpack.c.l.b16 %v2552_v48 }
 0x6b7   : > { %1363 = vmatpush.bf16.xpose.msrb.mxu1 %v1354_v49 }
 0x6b8   : > { %v1346_v50 = vpop.f32.mrf.mxu0  ;;  %v1492_v34 = vpack.c.b16 %v1491_v33, %v1491_v33 }
 0x6b9   : > { %v1407_v58 = vmul.f32 0.35355338, %v1346_v50 }
 0x6bb   : > { %v1414_v60 = vadd.f32 %v2093_v56, %v1407_v58 }
 0x6bd   : > { %v1418_v61 = vsel %vm902_vm1, %v1414_v60, -inf }
 0x6be   : > { %1966 = vmatmul.msk.bf16.vlgmr.msrb.gmra.mxu1 %vm902_vm1, %v1324_v52 }
 0x6c0   : > { %v1348_v53 = vpop.f32.mrf.mxu0 }
 0x71a   : > { %v1384_v54 = vpop.f32.mrf.mxu2 }
 0x71b   : > { %v1409_v55 = vmul.f32 0.35355338, %v1384_v54 }
 0x71d   : > { %v1416_v57 = vadd.f32 %v2093_v56, %v1409_v55 }
 0x71f   : > { %v1424_v2 = vsel %vm902_vm1, %v1416_v57, -inf }
 0x720   : > { %1425 = vmax.xlane.f32.xlu1 %v1424_v2 }
 0x722   : > { %v1386_v59 = vpop.f32.mrf.mxu2 }
 0x728   : > { %1419 = vmax.xlane.f32.xlu1 %v1418_v61 }
 0x731   : > { %v1403_v62 = vpop.f32.mrf.mxu3 }
 0x732   : > { %v1410_v63 = vmul.f32 0.35355338, %v1403_v62 }
 0x734   : > { %v1417_v0 = vadd.f32 %v2093_v56, %v1410_v63 }
 0x736   : > { %v1427_v3 = vsel %vm902_vm1, %v1417_v0, -inf }
 0x737   : > { %1428 = vmax.xlane.f32.xlu2 %v1427_v3 }
 0x739   : > { %v1405_v4 = vpop.f32.mrf.mxu3 }
 0x73b   : > { %v1365_v5 = vpop.f32.mrf.mxu1 }
 0x73c   : > { %v1408_v6 = vmul.f32 0.35355338, %v1365_v5 }
 0x73e   : > { %v1415_v7 = vadd.f32 %v2093_v56, %v1408_v6 }
 0x740   : > { %v1421_v8 = vsel %vm902_vm1, %v1415_v7, -inf }
 0x741   : > { %1422 = vmax.xlane.f32.xlu0 %v1421_v8  ;;  %v2030_v8 = vld [vmem:[%s2700_s14 + $0x8] sm:$0xff] }
 0x743   : > { %v1367_v9 = vpop.f32.mrf.mxu1 }
 0x744   : > { %v2029_v9 = vld [vmem:[%s2700_s14] sm:$0xff] }
 0x793   : > { %v1426_v11 = vpop.xlane.xlu1 %1425 }
 0x794   : > { %v1432_v12 = vsub.f32 %v1416_v57, %v1426_v11 }
 0x796   : > { %v1438_v13 = vmul.f32 1.442695, %v1432_v12 }
 0x798   : > { %2122 = vpow2.f32 %v1438_v13 }
 0x79b   : > { %v1420_v35 = vpop.xlane.xlu1 %1419 }
 0x79c   : > { %v1430_v36 = vsub.f32 %v1414_v60, %v1420_v35 }
 0x79e   : > { %v2123_v15 = vpop.eup %2122  ;;  %v1434_v14 = vmul.f32 1.442695, %v1430_v36 }
 0x79f   : > { %v1448_v16 = vsel %vm902_vm1, %v2123_v15, 0.0 }
 0x7a0   : > { %1449 = vadd.xlane.f32.xlu2 %v1448_v16 }
 0x7aa   : > { %v1429_v10 = vpop.xlane.xlu2 %1428 }
 0x7ab   : > { %v1433_v17 = vsub.f32 %v1417_v0, %v1429_v10 }
 0x7ad   : > { %v1440_v18 = vmul.f32 1.442695, %v1433_v17 }
 0x7af   : > { %2124 = vpow2.f32 %v1440_v18  ;;  %v2094_v18 = vld [vmem:[%s2701_s15] ss:$0 sm:$0xff] }
 0x7b4   : > { %v1423_v20 = vpop.xlane.xlu0 %1422 }
 0x7b5   : > { %v2125_v21 = vpop.eup %2124  ;;  %v1431_v22 = vsub.f32 %v1415_v7, %v1423_v20 }
 0x7b6   : > { %v1451_v24 = vsel %vm902_vm1, %v2125_v21, 0.0 }
 0x7b7   : > { %v1436_v25 = vmul.f32 1.442695, %v1431_v22  ;;  %1452 = vadd.xlane.f32.xlu0 %v1451_v24 }
 0x7b8   : > { %1517 = vrot.lane.b32.xlu2 %v1516_v23, %s2772_s9 }
 0x7b9   : > { %2126 = vpow2.f32 %v1436_v25 }
 0x7ba   : > { %2128 = vpow2.f32 %v1434_v14 }
 0x7bf   : > { %v2127_v28 = vpop.eup %2126 }
 0x7c0   : > { %1469 = vrot.lane.b32.xlu2 %v1468_v27, %s2772_s9  ;;  %v1445_v29 = vsel %vm902_vm1, %v2127_v28, 0.0  ;;  %v2129_v37 = vpop.eup %2128 }
 0x7c1   : > { %1446 = vadd.xlane.f32.xlu1 %v1445_v29  ;;  %v1442_v38 = vsel %vm902_vm1, %v2129_v37, 0.0  ;;  %v2032_v29 = vld [vmem:[%s2704_s18 + $0x8] sm:$0xff] }
 0x7cb   : > { %1541 = vrot.lane.b32.xlu0 %v1540_v32, %s2772_s9 }
 0x7da   : > { %1493 = vrot.lane.b32.xlu1 %v1492_v34, %s2772_s9  ;;  %v2035_v34 = vld [vmem:[%s2706_s20 + $0x10] sm:$0xff]  ;;  %s1917_s9 = sshll.u32 %s817_s4, 3 }
 0x7db   : > { %s819_s0 = scalar_lea.vmem [#allocation2], %s1917_s9  ;;  %s2162_s9 = scalar_lea.hbm %s2712_s26, 16 }
 0x7dc   : > { %s1818_s1 = sshll.u32 %s819_s0, 4  ;;  %s1819_s1 = int_to_ptr.vmem [resolvable:$true] %s1818_s1 }
 0x7f5   : > { %1443 = vadd.xlane.f32.xlu0 %v1442_v38 }
 0x813   : > { %v1450_v39 = vpop.xlane.xlu2 %1449 }
 0x814   : > { %2130 = vrcp.f32 %v1450_v39 }
 0x81a   : > { %v2131_v40 = vpop.eup %2130 }
 0x81b   : > { %v1460_v41 = vmul.f32 %v2131_v40, %v2123_v15  ;;  %v1518_v42 = vpop.permute.xlu2 %1517 }
 0x81c   : > { %v1523_v43 = vsel %vm1055_vm2, %v1518_v42, 0 }
 0x81d   : > { %v1464_v44 = vpack.c.bf16 %v1460_v41, %v1460_v41  ;;  %1532 = vmatpush.bf16.msra.mxu2 %v1523_v43  ;;  %v2095_v41 = vld [vmem:[%s2702_s16] ss:$0 sm:$0xff] }
 0x81e   : > { %v2096_v43 = vld [vmem:[%s2703_s17] ss:$0 sm:$0xff] }
 0x820   : > { %1971 = vmatmul.msk.bf16.vlgmr.msra.gmra.mxu2 %vm902_vm1, %v1464_v44 }
 0x821   : > { %1725 = vmatpush.bf16.msrb.mxu2 %v2036_v31 }
 0x823   : > { %v1470_v45 = vpop.permute.xlu2 %1469 }
 0x824   : > { %v1475_v46 = vsel %vm1055_vm2, %v1470_v45, 0 }
 0x825   : > { %1484 = vmatpush.bf16.msra.mxu0 %v1475_v46  ;;  %1726 = vmatpush.bf16.msrb.mxu2 %v2035_v34 }
 0x829   : > { %1602 = vmatpush.bf16.msrb.mxu0 %v2030_v8 }
 0x82a   : > { %v1453_v47 = vpop.xlane.xlu0 %1452 }
 0x82b   : > { %2132 = vrcp.f32 %v1453_v47 }
 0x82d   : > { %1603 = vmatpush.bf16.msrb.mxu0 %v2029_v9 }
 0x831   : > { %v2133_v48 = vpop.eup %2132 }
 0x832   : > { %v1461_v49 = vmul.f32 %v2133_v48, %v2125_v21  ;;  %v2034_v48 = vld [vmem:[%s2706_s20 + $0x8] sm:$0xff] }
 0x833   : > { %1727 = vmatpush.bf16.msrb.mxu2 %v2034_v48 }
 0x834   : > { %v1447_v52 = vpop.xlane.xlu1 %1446  ;;  %v1465_v53 = vpack.c.bf16 %v1461_v49, %v1461_v49  ;;  %v2033_v49 = vld [vmem:[%s2706_s20] sm:$0xff] }
 0x835   : > { %2134 = vrcp.f32 %v1447_v52 }
 0x837   : > { %1728 = vmatpush.bf16.msrb.mxu2 %v2033_v49 }
 0x83b   : > { %v2135_v54 = vpop.eup %2134 }
 0x83c   : > { %v1459_v55 = vmul.f32 %v2135_v54, %v2127_v28 }
 0x83d   : > { %v1542_v50 = vpop.permute.xlu0 %1541 }
 0x83e   : > { %v1547_v51 = vsel %vm1055_vm2, %v1542_v50, 0  ;;  %v1463_v58 = vpack.c.bf16 %v1459_v55, %v1459_v55  ;;  %v2097_v50 = vld [vmem:[%s2705_s19] ss:$0 sm:$0xff] }
 0x83f   : > { %1556 = vmatpush.bf16.msra.mxu3 %v1547_v51 }
 0x842   : > { %1972 = vmatmul.msk.bf16.vlgmr.msra.gmra.mxu3 %vm902_vm1, %v1465_v53 }
 0x84c   : > { %v1494_v56 = vpop.permute.xlu1 %1493 }
 0x84d   : > { %v1499_v57 = vsel %vm1055_vm2, %v1494_v56, 0  ;;  %v2098_v56 = vld [vmem:[%s2707_s21] ss:$0 sm:$0xff] }
 0x84e   : > { %1508 = vmatpush.bf16.msra.mxu1 %v1499_v57 }
 0x851   : > { %1970 = vmatmul.msk.bf16.vlgmr.msra.gmra.mxu1 %vm902_vm1, %v1463_v58 }
 0x852   : > { %1681 = vmatpush.bf16.msrb.mxu1 %v2032_v29 }
 0x868   : > { %v1444_v2 = vpop.xlane.xlu0 %1443 }
 0x869   : > { %2136 = vrcp.f32 %v1444_v2 }
 0x86f   : > { %v2137_v59 = vpop.eup %2136 }
 0x870   : > { %v1458_v60 = vmul.f32 %v2137_v59, %v2129_v37 }
 0x872   : > { %v1462_v61 = vpack.c.bf16 %v1458_v60, %v1458_v60 }
 0x874   : > { %1969 = vmatmul.msk.bf16.vlgmr.msra.gmra.mxu0 %vm902_vm1, %v1462_v61 }
 0x8a3   : > { %v1534_v62 = vpop.f32.mrf.mxu2 }
 0x8a4   : > { %1567 = vrot.lane.b32.xlu2 %v1534_v62, %s2773_s5 }
 0x8ab   : > { %v1536_v63 = vpop.f32.mrf.mxu2 }
 0x8c5   : > { %v1558_v0 = vpop.f32.mrf.mxu3 }
 0x8cd   : > { %v1560_v3 = vpop.f32.mrf.mxu3 }
 0x8ce   : > { %v1510_v4 = vpop.f32.mrf.mxu1 }
 0x8cf   : > { %1563 = vrot.lane.b32.xlu1 %v1510_v4, %s2774_s7  ;;  %v2038_v4 = vld [vmem:[%s2710_s24 + $0x8] sm:$0xff] }
 0x8d0   : > { %1797 = vmatpush.bf16.msrb.mxu3 %v2038_v4 }
 0x8d6   : > { %v1512_v5 = vpop.f32.mrf.mxu1 }
 0x8d7   : > { %1571 = vrot.lane.b32.xlu1 %v1558_v0, %s2775_s10  ;;  %v2037_v5 = vld [vmem:[%s2710_s24] sm:$0xff]  ;;  %s1816_s10 = scalar_lea.hbm %s2712_s26, %s2018_s27 }
 0x8d8   : > { %1798 = vmatpush.bf16.msrb.mxu3 %v2037_v5  ;;  %s1820_s6 = sshll.u32 %s1816_s10, 4  ;;  %s1821_s6 = int_to_ptr.hbm [resolvable:$true] %s1820_s6 }
 0x8d9   : > { %s2156_s11 = sshra.s32 %s1821_s6, 4  ;;  %s2157_s11 = int_to_ptr.hbm [resolvable:$true] %s2156_s11 }
 0x8da   : > { %s2158_s12 = scalar_lea.hbm %s2157_s11, 8  ;;  %p2163_p0 = scmp.lt.s32.totalorder %s2157_s11, %s2712_s26 }
 0x8db   : > { %p2159_p11 = scmp.ne.s32.totalorder %s2157_s11, %s2158_s12  ;;  %p2164_p1 = scmp.lt.s32.totalorder %s2162_s9, %s2158_s12 }
 0x8dd   : > { %p2160_p12 = pnand %p2159_p11, %p2388_p5  ;;  %p2165_p2 = por %p2164_p1, %p2163_p0 }
 0x8df   : > { %p2161_p13 = pneg %p2160_p12 }
 0x8e1   : > { %p2166_p3 = pnand %p2165_p2, %p2161_p13 }
 0x8f1   : > { %v1486_v6 = vpop.f32.mrf.mxu0 }
 0x8f9   : > { %v1488_v7 = vpop.f32.mrf.mxu0 }
 0x8fe   : > { %v1568_v13 = vpop.permute.xlu2 %1567 }
 0x941   : > { %v1564_v11 = vpop.permute.xlu1 %1563 }
 0x942   : > { %v1574_v12 = vsel %vm902_vm1, %v1486_v6, %v1564_v11 }
 0x943   : > { %v1575_v15 = vsel %vm1148_vm3, %v1574_v12, %v1568_v13 }
 0x949   : > { %v1572_v16 = vpop.permute.xlu1 %1571 }
 0x94a   : > { %v1576_v10 = vsel %vm1150_vm4, %v1575_v15, %v1572_v16 }
 0x94b   : > { %v1577_v17 = vpack.c.bf16 %v1576_v10, %v1576_v10  ;;  %v2099_v10 = vld [vmem:[%s2708_s22] ss:$0 sm:$0xff] }
 0x94d   : > { %1981 = vmatmul.msk.bf16.vlgmr.msrb.gmra.mxu0 %vm866_vm0, %v1577_v17 }
 0x9ca   : > { %v1605_v19 = vpop.f32.mrf.mxu0 }
 0x9cb   : > { %v1606_v20 = vadd.f32 %v2094_v18, %v1605_v19 }
 0x9cd   : > { %v1609_v21 = vadd.f32 %v1606_v20, %v2525_v30  ;;  %v2031_v30 = vld [vmem:[%s2704_s18] sm:$0xff] }
 0x9ce   : > { %1682 = vmatpush.bf16.msrb.mxu1 %v2031_v30 }
 0x9cf   : > { %v1612_v22 = vsel %vm866_vm0, %v1609_v21, 0.0 }
 0x9d0   : > { %1613 = vadd.xlane.f32.xlu2 %v1612_v22  ;;  %v2101_v22 = vld [vmem:[%s2711_s25] ss:$0 sm:$0xff] }
 0x9d2   : > { %v1607_v23 = vpop.f32.mrf.mxu0 }
 0xa43   : > { %v1614_v24 = vpop.xlane.xlu2 %1613 }
 0xa44   : > { %v1615_v25 = vmul.f32 %v1614_v24, %v2499_v1 }
 0xa46   : > { %v1616_v26 = vsub.f32 %v1609_v21, %v1615_v25 }
 0xa48   : > { %v1617_v27 = vmul.f32 %v1616_v26, %v1616_v26 }
 0xa4a   : > { %v1618_v28 = vsel %vm866_vm0, %v1617_v27, 0.0 }
 0xa4b   : > { %1619 = vadd.xlane.f32.xlu1 %v1618_v28 }
 0xabe   : > { %v1620_v32 = vpop.xlane.xlu1 %1619 }
 0xabf   : > { %v1621_v33 = vmul.f32 %v1620_v32, %v2499_v1 }
 0xac1   : > { %v1622_v35 = vadd.f32 1e-05, %v1621_v33 }
 0xac3   : > { %2138 = vrsqrt.f32 %v1622_v35  ;;  %vm1629_vm10 = vweird.f32 %v1622_v35 }
 0xac9   : > { %v2139_v36 = vpop.eup %2138 }
 0xaca   : > { %v1624_v14 = vmul.f32 %v2139_v36, %v1622_v35  ;;  %vm1630_vm9 = vweird.f32 %v2139_v36 }
 0xacb   : > { %vm1631_vm11 = vmor %vm1629_vm10, %vm1630_vm9 }
 0xacc   : > { %v1625_v37 = vmul.f32 %v2139_v36, %v1624_v14 }
 0xace   : > { %v1626_v38 = vmul.f32 0.5, %v1625_v37 }
 0xad0   : > { %v1627_v39 = vsub.f32 1.5, %v1626_v38 }
 0xad2   : > { %v1628_v40 = vmul.f32 %v2139_v36, %v1627_v39 }
 0xad4   : > { %v1632_v42 = vsel %vm1631_vm11, %v2139_v36, %v1628_v40 }
 0xad5   : > { %v1633_v44 = vmul.f32 %v1632_v42, %v1616_v26 }
 0xad7   : > { %v1637_v45 = vmul.f32 %v2095_v41, %v1633_v44 }
 0xad9   : > { %v1641_v46 = vadd.f32 %v2096_v43, %v1637_v45 }
 0xadb   : > { %v1656_v47 = vpack.c.bf16 %v1641_v46, %v1641_v46 }
 0xadd   : > { %1990 = vmatmul.msk.bf16.vlgmr.msrb.gmra.mxu1 %vm866_vm0, %v1656_v47 }
 0xb5a   : > { %v1684_v51 = vpop.f32.mrf.mxu1 }
 0xb5b   : > { %v1685_v52 = vadd.f32 %v2097_v50, %v1684_v51 }
 0xb5d   : > { %v1688_v53 = vmax.f32 %v1685_v52, 0.0 }
 0xb5f   : > { %v1689_v54 = vpack.c.bf16 %v1688_v53, %v1688_v53 }
 0xb61   : > { %2007 = vmatmul.msk.bf16.vlgmr.msrb.gmra.mxu2 %vm1717_vm12, %v1689_v54 }
 0xb62   : > { %v1686_v55 = vpop.f32.mrf.mxu1 }
 0xbe4   : > { %v1730_v57 = vpop.f32.mrf.mxu2 }
 0xbe5   : > { %v1731_v58 = vadd.f32 %v2098_v56, %v1730_v57 }
 0xbe7   : > { %v1734_v2 = vadd.f32 %v1731_v58, %v1641_v46 }
 0xbe9   : > { %v1737_v59 = vsel %vm866_vm0, %v1734_v2, 0.0 }
 0xbea   : > { %1738 = vadd.xlane.f32.xlu0 %v1737_v59 }
 0xbec   : > { %v1732_v60 = vpop.f32.mrf.mxu2 }
 0xc5d   : > { %v1739_v61 = vpop.xlane.xlu0 %1738 }
 0xc5e   : > { %v1740_v62 = vmul.f32 %v1739_v61, %v2499_v1 }
 0xc60   : > { %v1741_v63 = vsub.f32 %v1734_v2, %v1740_v62 }
 0xc62   : > { %v1742_v0 = vmul.f32 %v1741_v63, %v1741_v63 }
 0xc64   : > { %v1743_v3 = vsel %vm866_vm0, %v1742_v0, 0.0 }
 0xc65   : > { %1744 = vadd.xlane.f32.xlu0 %v1743_v3 }
 0xcd8   : > { %v1745_v6 = vpop.xlane.xlu0 %1744 }
 0xcd9   : > { %v1746_v7 = vmul.f32 %v1745_v6, %v2499_v1  ;;  %v2100_v1 = vld [vmem:[%s2709_s23] ss:$0 sm:$0xff] }
 0xcdb   : > { %v1747_v8 = vadd.f32 1e-05, %v1746_v7 }
 0xcdd   : > { %2140 = vrsqrt.f32 %v1747_v8  ;;  %vm1754_vm14 = vweird.f32 %v1747_v8 }
 0xce3   : > { %v2141_v9 = vpop.eup %2140 }
 0xce4   : > { %v1749_v11 = vmul.f32 %v2141_v9, %v1747_v8  ;;  %vm1755_vm13 = vweird.f32 %v2141_v9 }
 0xce5   : > { %vm1756_vm15 = vmor %vm1754_vm14, %vm1755_vm13 }
 0xce6   : > { %v1750_v12 = vmul.f32 %v2141_v9, %v1749_v11 }
 0xce8   : > { %v1751_v13 = vmul.f32 0.5, %v1750_v12 }
 0xcea   : > { %v1752_v15 = vsub.f32 1.5, %v1751_v13 }
 0xcec   : > { %v1753_v16 = vmul.f32 %v2141_v9, %v1752_v15 }
 0xcee   : > { %v1757_v17 = vsel %vm1756_vm15, %v2141_v9, %v1753_v16 }
 0xcef   : > { %v1758_v18 = vmul.f32 %v1757_v17, %v1741_v63 }
 0xcf1   : > { %v1762_v19 = vmul.f32 %v2099_v10, %v1758_v18 }
 0xcf3   : > { %v1766_v20 = vadd.f32 %v2100_v1, %v1762_v19 }
 0xcf5   : > { %v1767_v21 = vpack.c.bf16 %v1766_v20, %v1766_v20 }
 0xcf7   : > { %2016 = vmatmul.msk.bf16.vlgmr.msrb.gmra.mxu3 %vm866_vm0, %v1767_v21 }
 0xd7a   : > { %v1800_v23 = vpop.f32.mrf.mxu3 }
 0xd7b   : > { %v1801_v24 = vadd.f32 %v2101_v22, %v1800_v23 }
 0xd7d   : > { %1804 = vst.msk [vmem:[%s819_s0] sm:$0xff] %vm1148_vm3, %v1801_v24 }
 0xd7e   : > { %2169 = shalt.err (!%p2166_p3)
}
 0xd7f   : > { %2039 = dma.vmem_to_hbm [thread:$0]  (%p2388_p5), %s1819_s1, 128, %s1821_s6, %s1806_s8  }
 0xd82   : > { %v1802_v25 = vpop.f32.mrf.mxu3 }
 0xd83 PF: > { %s2776_s0 = sld [smem:[#allocation5_spill]]  ;;  %p2045_p4 = scmp.ge.s32.totalorder %s2204_s28, 2 }
 0xd85   : > { %p2042_p7 = pnand %p2045_p4, %p2392_p6 }
 0xd87   : > { %p2043_p8 = pneg %p2042_p7 }
 0xd89   : > { %s1832_s29 = sand.u32 1, %s2776_s0  }
 0xd8a   : > { %s1833_s30 = scalar_lea.sflag [#allocation3], %s1832_s29 }
 0xd8b   : > { %2187 = dma.done.wait (%p2043_p8), %s1833_s30, 128  }
 0xd8c   : > { %2189 = vsyncadd (%p2043_p8), %s1833_s30, 4294967168  ;;  %s2778_s28 = sld [smem:[#allocation7_spill]]  ;;  %s2781_s27 = smov %s2196_s3 }
 0xd8d   : > { %s2779_s11 = sld [smem:[#allocation6_spill]] }
 0xd8e   : > { %s2780_s7 = sld [smem:[#allocation8_spill]] }
 0xd92   : > { %p36_p9 = scmp.ge.s32.totalorder %s2778_s28, 4  }
 0xd93   : > { %s2782_s3 = smov %s2779_s11 }
 0xd94   :  { %38 = sbr.rel (!%p36_p9) target bundleno = 17 (0x11), region = 168 }
 0xd99   :  { %1839 = vsyncpa [#allocation3], 1 }
 0xd9a   :  { %1841 = vsyncpa [#allocation3 + $0x1], 1 }

</bundles_post_ra>
